<compile_context>
chip_gen: v5e
topology: v5e:2x2
jax: 0.10.0
libtpu: 0.0.40
codegen_flags: <defaults>
</compile_context>

<pallas_src>
import functools
import math

import jax
import jax.numpy as jnp
from jax.experimental import pallas as pl
from jax.experimental.pallas import tpu as pltpu


_LAYER_PARAM_ORDER = ('wq', 'bq', 'wk', 'bk', 'wv', 'bv', 'wo', 'bo',
                      'ln1_g', 'ln1_b', 'w1', 'b1', 'w2', 'b2', 'ln2_g', 'ln2_b')


# ----------------------------- Pallas kernels -------------------------------


def _layer_norm(x, gamma, beta, eps=1e-5):
    # TODO(synk): eps taken from PyTorch nn.LayerNorm default (reference Encoder unavailable).
    mu = jnp.mean(x, axis=-1, keepdims=True)
    var = jnp.mean(jnp.square(x - mu), axis=-1, keepdims=True)
    return (x - mu) * jax.lax.rsqrt(var + eps) * gamma + beta


def encoder_stack_kernel(n_head,
                         x_ref,
                         wq_ref, bq_ref, wk_ref, bk_ref, wv_ref, bv_ref,
                         wo_ref, bo_ref, ln1_g_ref, ln1_b_ref,
                         w1_ref, b1_ref, w2_ref, b2_ref, ln2_g_ref, ln2_b_ref,
                         y_ref):
    """All encoder layers fused; grid = (batch, layer).

    The activation of the current batch element lives in the output block
    (whose block index is constant across the layer axis), so it stays resident
    in VMEM for the whole layer stack.  Weights for layer `l` stream in per
    grid step (double-buffered by the BlockSpec pipeline).
    """
    l = pl.program_id(1)

    _, S, H = x_ref.shape
    dh = H // n_head

    # Layer 0: seed the resident activation from the embedding input.
    @pl.when(l == 0)
    def _():
        y_ref[...] = x_ref[...]

    x = y_ref[0]                                     # (S, H) float32, VMEM-resident
    xb = x.astype(jnp.bfloat16)

    def proj(w_ref, b_ref):
        # bf16 operands on the MXU, f32 accumulation; bias add in f32.
        return jnp.dot(xb, w_ref[0], preferred_element_type=jnp.float32) + b_ref[0]

    # 1/sqrt(dh) is pre-folded into wq / bq on the host side.
    q = proj(wq_ref, bq_ref).astype(jnp.bfloat16)    # (S, H)
    k = proj(wk_ref, bk_ref).astype(jnp.bfloat16)
    v = proj(wv_ref, bv_ref).astype(jnp.bfloat16)

    wo = wo_ref[0]                                   # (H, H) bf16
    nt = (((1,), (1,)), ((), ()))                    # contract last dims: q @ k^T (no transpose op)

    attn = jnp.zeros((S, H), jnp.float32)
    for h in range(n_head):                          # static head loop (dh << 128 at this size)
        sl = slice(h * dh, (h + 1) * dh)
        s = jax.lax.dot_general(q[:, sl], k[:, sl], nt,
                                preferred_element_type=jnp.float32)   # (S, S)
        s = s - jnp.max(s, axis=-1, keepdims=True)
        p = jnp.exp(s)
        p = p * pl.reciprocal(jnp.sum(p, axis=-1, keepdims=True), approx=True)
        ctx = jnp.dot(p.astype(jnp.bfloat16), v[:, sl],
                      preferred_element_type=jnp.float32)             # (S, dh)
        # ctx_full @ Wo == sum_h ctx_h @ Wo[h*dh:(h+1)*dh, :]  -> no concat relayout.
        attn = attn + jnp.dot(ctx.astype(jnp.bfloat16), wo[sl, :],
                              preferred_element_type=jnp.float32)
    attn = attn + bo_ref[0]

    x1 = _layer_norm(x + attn, ln1_g_ref[0], ln1_b_ref[0])

    hid = jnp.dot(x1.astype(jnp.bfloat16), w1_ref[0],
                  preferred_element_type=jnp.float32) + b1_ref[0]
    hid = jax.nn.gelu(hid, approximate=True)         # tanh GELU -> EUP
    ffn = jnp.dot(hid.astype(jnp.bfloat16), w2_ref[0],
                  preferred_element_type=jnp.float32) + b2_ref[0]
    y = _layer_norm(x1 + ffn, ln2_g_ref[0], ln2_b_ref[0])

    y_ref[0] = y.astype(y_ref.dtype)                 # resident; flushed to HBM once per batch elem


def logits_kernel(m_ref, t_ref, o_ref):
    # (B, H) x (TILE_V, H) contracting on H  ->  (B, TILE_V); no host-side transpose.
    o_ref[...] = jax.lax.dot_general(
        m_ref[...], t_ref[...], (((1,), (1,)), ((), ())),
        preferred_element_type=jnp.float32).astype(o_ref.dtype)


# ------------------------------ Pallas wrappers ------------------------------


def encoder_stack(x, stacked_params, n_head, n_layer):
    """Run all encoder layers in a single pallas_call."""
    B, S, H = x.shape
    kernel = functools.partial(encoder_stack_kernel, n_head)

    in_specs = [pl.BlockSpec((1, S, H), lambda b, l: (b, 0, 0))]
    args = [x]
    for name in _LAYER_PARAM_ORDER:
        w = stacked_params[name]                     # (n_layer, d0, d1)
        in_specs.append(pl.BlockSpec((1,) + w.shape[1:], lambda b, l: (l, 0, 0)))
        args.append(w)

    return pl.pallas_call(
        kernel,
        out_shape=jax.ShapeDtypeStruct((B, S, H), jnp.float32),
        grid=(B, n_layer),
        in_specs=in_specs,
        out_specs=pl.BlockSpec((1, S, H), lambda b, l: (b, 0, 0)),
        compiler_params=pltpu.CompilerParams(
            dimension_semantics=("parallel", "arbitrary"),
            vmem_limit_bytes=32 * 1024 * 1024),
    )(*args)


def vocab_logits(mask_emb, emb_table_bf16, tile_v=512):
    """mask_emb (B, H) against emb_table (V, H), tiled over V, contracting on H."""
    B, H = mask_emb.shape
    V = emb_table_bf16.shape[0]
    if V % tile_v != 0:
        tile_v = V                                   # toy / irregular vocab sizes: single tile
    return pl.pallas_call(
        logits_kernel,
        out_shape=jax.ShapeDtypeStruct((B, V), jnp.float32),
        grid=(V // tile_v,),
        in_specs=[pl.BlockSpec((B, H), lambda j: (0, 0)),
                  pl.BlockSpec((tile_v, H), lambda j: (j, 0))],
        out_specs=pl.BlockSpec((B, tile_v), lambda j: (0, j)),
        compiler_params=pltpu.CompilerParams(dimension_semantics=("parallel",)),
    )(mask_emb.astype(jnp.bfloat16), emb_table_bf16)


# -------------------------------- Model glue ---------------------------------


class KnowformerPallas:
    def __init__(self, config, key):
        self.emb_size = config['hidden_size']
        self.n_layer = config['num_hidden_layers']
        self.n_head = config['num_attention_heads']
        self.intermediate = config['intermediate_size']
        self.voc_size = config['vocab_size']
        init_range = config['initializer_range']

        H, I, L = self.emb_size, self.intermediate, self.n_layer
        assert H % self.n_head == 0
        dh = H // self.n_head
        qk_scale = 1.0 / math.sqrt(dh)

        keys = iter(jax.random.split(key, 1 + L * 6))

        def normal(shape):
            return jax.random.normal(next(keys), shape, jnp.float32) * init_range

        # Embeddings.lut : nn.Embedding(vocab_size, hidden_size)
        self.emb_table = normal((self.voc_size, H))                   # f32 for the gather
        self.emb_table_bf16 = self.emb_table.astype(jnp.bfloat16)     # bf16 copy for the MXU

        layers = []
        for _ in range(L):
            layers.append({
                # 1/sqrt(dh) folded into the Q projection (weight + bias).
                'wq': (normal((H, H)) * qk_scale).astype(jnp.bfloat16),
                'bq': jnp.zeros((1, H), jnp.float32),
                'wk': normal((H, H)).astype(jnp.bfloat16),
                'bk': jnp.zeros((1, H), jnp.float32),
                'wv': normal((H, H)).astype(jnp.bfloat16),
                'bv': jnp.zeros((1, H), jnp.float32),
                'wo': normal((H, H)).astype(jnp.bfloat16),
                'bo': jnp.zeros((1, H), jnp.float32),
                'ln1_g': jnp.ones((1, H), jnp.float32),
                'ln1_b': jnp.zeros((1, H), jnp.float32),
                'w1': normal((H, I)).astype(jnp.bfloat16),
                'b1': jnp.zeros((1, I), jnp.float32),
                'w2': normal((I, H)).astype(jnp.bfloat16),
                'b2': jnp.zeros((1, H), jnp.float32),
                'ln2_g': jnp.ones((1, H), jnp.float32),
                'ln2_b': jnp.zeros((1, H), jnp.float32),
            })
        # Stack per-layer params along a leading (n_layer, ...) axis so the whole
        # encoder runs as one pallas_call with grid=(batch, layer).
        self.stacked = {name: jnp.stack([p[name] for p in layers], axis=0)
                        for name in _LAYER_PARAM_ORDER}

    def _forward_triples(self, src_ids, neighbor_ids):
        emb_out = self.emb_table[src_ids]                       # (B, 4, H)
        # input_dropout_layer: identity in eval mode
        if neighbor_ids is not None and neighbor_ids.shape[1] > 0:
            neighbor_out = self.emb_table[neighbor_ids]         # (B, Nn, H)
            emb_out = jnp.concatenate([emb_out, neighbor_out], axis=1)
        return encoder_stack(emb_out, self.stacked, self.n_head, self.n_layer)

    def __call__(self, src_ids, neighbor_ids, neighbors_trustworthy,
                 kgc=False, head_mask=False, each_layer=False):
        # TODO(synk): neighbors_trustworthy re-weighting and each_layer=True per-layer outputs
        # are not reproduced (reference Encoder source unavailable); args accepted & ignored.
        seq_emb_out = self._forward_triples(src_ids, neighbor_ids)
        if not kgc:
            cls_emb_with_neighbor = seq_emb_out[:, 1:4, :]
            b, w, e = cls_emb_with_neighbor.shape
            result = cls_emb_with_neighbor.reshape(b, w * e)
            logit = None
        else:
            mask_emb = seq_emb_out[:, 1, :] if head_mask else seq_emb_out[:, 3, :]
            logit = seq_emb_out[:, 1:4, :]
            result = vocab_logits(mask_emb, self.emb_table_bf16)
        return result, logit


# ----------------------------------- Main ------------------------------------

if __name__ == "__main__":
    config = {
        'hidden_size': 32,
        'num_hidden_layers': 2,
        'num_attention_heads': 4,
        'input_dropout_prob': 0.1,
        'attention_dropout_prob': 0.1,
        'hidden_dropout_prob': 0.1,
        'residual_dropout_prob': 0.1,
        'context_dropout_prob': 0.1,
        'initializer_range': 0.02,
        'intermediate_size': 64,
        'vocab_size': 64,
        'num_relations': 8,
        'device': None,
    }

    root = jax.random.PRNGKey(0)
    k_model, k_src, k_nbr = jax.random.split(root, 3)

    model = KnowformerPallas(config, k_model)

    B = 2
    src_ids = jax.random.randint(k_src, (B, 4), 0, config['vocab_size'])        # [CLS, h, r, t]
    neighbor_ids = jax.random.randint(k_nbr, (B, 4), 0, config['vocab_size'])   # 4 neighbors
    neighbors_trustworthy = jnp.ones((B, 4), jnp.float32)

    # kgc=True path: logits over vocab from the tail-mask position (index 3)
    result, logit = model(src_ids, neighbor_ids, neighbors_trustworthy,
                          kgc=True, head_mask=False)
    jax.block_until_ready(result)
    jax.block_until_ready(logit)
    assert result.shape == (B, config['vocab_size'])
    assert logit.shape == (B, 3, config['hidden_size'])
    assert bool(jnp.isfinite(result).all())
    assert bool(jnp.isfinite(logit).all())

    # kgc=False path: flattened (h, r, t) representation
    result2, logit2 = model(src_ids, neighbor_ids, neighbors_trustworthy, kgc=False)
    jax.block_until_ready(result2)
    assert result2.shape == (B, 3 * config['hidden_size'])
    assert logit2 is None
    assert bool(jnp.isfinite(result2).all())

    print("KERNEL_OK")
</pallas_src>

<mosaic_0001>
module attributes {stable_mosaic.version = 11 : i64} {
  func.func @encoder_stack_kernel(%arg0: i32, %arg1: i32, %arg2: memref<1x8x32xf32, #tpu.memory_space<vmem>>, %arg3: memref<1x32x32xbf16, #tpu.memory_space<vmem>>, %arg4: memref<1x1x32xf32, #tpu.memory_space<vmem>>, %arg5: memref<1x32x32xbf16, #tpu.memory_space<vmem>>, %arg6: memref<1x1x32xf32, #tpu.memory_space<vmem>>, %arg7: memref<1x32x32xbf16, #tpu.memory_space<vmem>>, %arg8: memref<1x1x32xf32, #tpu.memory_space<vmem>>, %arg9: memref<1x32x32xbf16, #tpu.memory_space<vmem>>, %arg10: memref<1x1x32xf32, #tpu.memory_space<vmem>>, %arg11: memref<1x1x32xf32, #tpu.memory_space<vmem>>, %arg12: memref<1x1x32xf32, #tpu.memory_space<vmem>>, %arg13: memref<1x32x64xbf16, #tpu.memory_space<vmem>>, %arg14: memref<1x1x64xf32, #tpu.memory_space<vmem>>, %arg15: memref<1x64x32xbf16, #tpu.memory_space<vmem>>, %arg16: memref<1x1x32xf32, #tpu.memory_space<vmem>>, %arg17: memref<1x1x32xf32, #tpu.memory_space<vmem>>, %arg18: memref<1x1x32xf32, #tpu.memory_space<vmem>>, %arg19: memref<1x8x32xf32, #tpu.memory_space<vmem>>) attributes {dimension_semantics = [#tpu.dimension_semantics<parallel>, #tpu.dimension_semantics<arbitrary>], iteration_bounds = array<i64: 2, 2>, scalar_prefetch = 0 : i64, scratch_operands = 0 : i64, tpu.core_type = #tpu.core_type<tc>, window_params = [{transform_indices = @transform_0, window_bounds = array<i64: 1, 8, 32>}, {transform_indices = @transform_1, window_bounds = array<i64: 1, 32, 32>}, {transform_indices = @transform_2, window_bounds = array<i64: 1, 1, 32>}, {transform_indices = @transform_3, window_bounds = array<i64: 1, 32, 32>}, {transform_indices = @transform_4, window_bounds = array<i64: 1, 1, 32>}, {transform_indices = @transform_5, window_bounds = array<i64: 1, 32, 32>}, {transform_indices = @transform_6, window_bounds = array<i64: 1, 1, 32>}, {transform_indices = @transform_7, window_bounds = array<i64: 1, 32, 32>}, {transform_indices = @transform_8, window_bounds = array<i64: 1, 1, 32>}, {transform_indices = @transform_9, window_bounds = array<i64: 1, 1, 32>}, {transform_indices = @transform_10, window_bounds = array<i64: 1, 1, 32>}, {transform_indices = @transform_11, window_bounds = array<i64: 1, 32, 64>}, {transform_indices = @transform_12, window_bounds = array<i64: 1, 1, 64>}, {transform_indices = @transform_13, window_bounds = array<i64: 1, 64, 32>}, {transform_indices = @transform_14, window_bounds = array<i64: 1, 1, 32>}, {transform_indices = @transform_15, window_bounds = array<i64: 1, 1, 32>}, {transform_indices = @transform_16, window_bounds = array<i64: 1, 1, 32>}, {transform_indices = @transform_17, window_bounds = array<i64: 1, 8, 32>}]} {
    %c0_i32 = arith.constant 0 : i32
    %0 = arith.cmpi eq, %arg1, %c0_i32 : i32
    %1 = arith.extui %0 : i1 to i32
    %c0_i32_0 = arith.constant 0 : i32
    %2 = arith.cmpi ne, %1, %c0_i32_0 : i32
    scf.if %2 {
      %c0_93 = arith.constant 0 : index
      %c0_94 = arith.constant 0 : index
      %c0_95 = arith.constant 0 : index
      %203 = vector.load %arg2[%c0_93, %c0_94, %c0_95] : memref<1x8x32xf32, #tpu.memory_space<vmem>>, vector<1x8x32xf32>
      %c0_96 = arith.constant 0 : index
      %c0_97 = arith.constant 0 : index
      %c0_98 = arith.constant 0 : index
      %204 = vector.load %arg19[%c0_96, %c0_97, %c0_98] : memref<1x8x32xf32, #tpu.memory_space<vmem>>, vector<1x8x32xf32>
      tpu.vector_store %arg19[%c0_96, %c0_97, %c0_98], %203 {strides = array<i32>} : memref<1x8x32xf32, #tpu.memory_space<vmem>>, vector<1x8x32xf32>,
    } else {
    }
    %c0 = arith.constant 0 : index
    %c0_1 = arith.constant 0 : index
    %c0_2 = arith.constant 0 : index
    %3 = vector.load %arg19[%c0, %c0_1, %c0_2] : memref<1x8x32xf32, #tpu.memory_space<vmem>>, vector<1x8x32xf32>
    %4 = vector.shape_cast %3 : vector<1x8x32xf32> to vector<8x32xf32>
    %5 = arith.truncf %4 : vector<8x32xf32> to vector<8x32xbf16>
    %c0_3 = arith.constant 0 : index
    %c0_4 = arith.constant 0 : index
    %c0_5 = arith.constant 0 : index
    %6 = vector.load %arg3[%c0_3, %c0_4, %c0_5] : memref<1x32x32xbf16, #tpu.memory_space<vmem>>, vector<1x32x32xbf16>
    %7 = vector.shape_cast %6 : vector<1x32x32xbf16> to vector<32x32xbf16>
    %cst = arith.constant dense<0.000000e+00> : vector<8x32xf32>
    %8 = tpu.matmul %5, %7, %cst {dimension_numbers = #tpu.dot_dimension_numbers<[1], [0], [0], [1], [0, 0, 1, 1], [], []>} : vector<8x32xbf16>, vector<32x32xbf16>, vector<8x32xf32> -> vector<8x32xf32>
    %c0_6 = arith.constant 0 : index
    %c0_7 = arith.constant 0 : index
    %c0_8 = arith.constant 0 : index
    %9 = vector.load %arg4[%c0_6, %c0_7, %c0_8] : memref<1x1x32xf32, #tpu.memory_space<vmem>>, vector<1x1x32xf32>
    %10 = vector.shape_cast %9 : vector<1x1x32xf32> to vector<1x32xf32>
    %11 = vector.broadcast %10 : vector<1x32xf32> to vector<8x32xf32>
    %12 = arith.addf %8, %11 : vector<8x32xf32>
    %13 = arith.truncf %12 : vector<8x32xf32> to vector<8x32xbf16>
    %c0_9 = arith.constant 0 : index
    %c0_10 = arith.constant 0 : index
    %c0_11 = arith.constant 0 : index
    %14 = vector.load %arg5[%c0_9, %c0_10, %c0_11] : memref<1x32x32xbf16, #tpu.memory_space<vmem>>, vector<1x32x32xbf16>
    %15 = vector.shape_cast %14 : vector<1x32x32xbf16> to vector<32x32xbf16>
    %cst_12 = arith.constant dense<0.000000e+00> : vector<8x32xf32>
    %16 = tpu.matmul %5, %15, %cst_12 {dimension_numbers = #tpu.dot_dimension_numbers<[1], [0], [0], [1], [0, 0, 1, 1], [], []>} : vector<8x32xbf16>, vector<32x32xbf16>, vector<8x32xf32> -> vector<8x32xf32>
    %c0_13 = arith.constant 0 : index
    %c0_14 = arith.constant 0 : index
    %c0_15 = arith.constant 0 : index
    %17 = vector.load %arg6[%c0_13, %c0_14, %c0_15] : memref<1x1x32xf32, #tpu.memory_space<vmem>>, vector<1x1x32xf32>
    %18 = vector.shape_cast %17 : vector<1x1x32xf32> to vector<1x32xf32>
    %19 = vector.broadcast %18 : vector<1x32xf32> to vector<8x32xf32>
    %20 = arith.addf %16, %19 : vector<8x32xf32>
    %21 = arith.truncf %20 : vector<8x32xf32> to vector<8x32xbf16>
    %c0_16 = arith.constant 0 : index
    %c0_17 = arith.constant 0 : index
    %c0_18 = arith.constant 0 : index
    %22 = vector.load %arg7[%c0_16, %c0_17, %c0_18] : memref<1x32x32xbf16, #tpu.memory_space<vmem>>, vector<1x32x32xbf16>
    %23 = vector.shape_cast %22 : vector<1x32x32xbf16> to vector<32x32xbf16>
    %cst_19 = arith.constant dense<0.000000e+00> : vector<8x32xf32>
    %24 = tpu.matmul %5, %23, %cst_19 {dimension_numbers = #tpu.dot_dimension_numbers<[1], [0], [0], [1], [0, 0, 1, 1], [], []>} : vector<8x32xbf16>, vector<32x32xbf16>, vector<8x32xf32> -> vector<8x32xf32>
    %c0_20 = arith.constant 0 : index
    %c0_21 = arith.constant 0 : index
    %c0_22 = arith.constant 0 : index
    %25 = vector.load %arg8[%c0_20, %c0_21, %c0_22] : memref<1x1x32xf32, #tpu.memory_space<vmem>>, vector<1x1x32xf32>
    %26 = vector.shape_cast %25 : vector<1x1x32xf32> to vector<1x32xf32>
    %27 = vector.broadcast %26 : vector<1x32xf32> to vector<8x32xf32>
    %28 = arith.addf %24, %27 : vector<8x32xf32>
    %29 = arith.truncf %28 : vector<8x32xf32> to vector<8x32xbf16>
    %c0_23 = arith.constant 0 : index
    %c0_24 = arith.constant 0 : index
    %c0_25 = arith.constant 0 : index
    %30 = vector.load %arg9[%c0_23, %c0_24, %c0_25] : memref<1x32x32xbf16, #tpu.memory_space<vmem>>, vector<1x32x32xbf16>
    %31 = vector.shape_cast %30 : vector<1x32x32xbf16> to vector<32x32xbf16>
    %cst_26 = arith.constant 0.000000e+00 : f32
    %32 = vector.broadcast %cst_26 : f32 to vector<8x32xf32>
    %33 = vector.extract_strided_slice %13 {offsets = [0, 0], sizes = [8, 8], strides = [1, 1]} : vector<8x32xbf16> to vector<8x8xbf16>
    %34 = vector.extract_strided_slice %21 {offsets = [0, 0], sizes = [8, 8], strides = [1, 1]} : vector<8x32xbf16> to vector<8x8xbf16>
    %cst_27 = arith.constant dense<0.000000e+00> : vector<8x8xf32>
    %35 = tpu.matmul %33, %34, %cst_27 {dimension_numbers = #tpu.dot_dimension_numbers<[1], [1], [0], [0], [0, 0, 1, 0], [], []>} : vector<8x8xbf16>, vector<8x8xbf16>, vector<8x8xf32> -> vector<8x8xf32>
    %cst_28 = arith.constant dense<0xFF800000> : vector<8xf32>
    %36 = vector.multi_reduction <maximumf>, %35, %cst_28 [1] : vector<8x8xf32> to vector<8xf32>
    %37 = vector.shape_cast %36 : vector<8xf32> to vector<8x1xf32>
    %38 = vector.broadcast %37 : vector<8x1xf32> to vector<8x8xf32>
    %39 = arith.subf %35, %38 : vector<8x8xf32>
    %40 = math.exp %39 : vector<8x8xf32>
    %cst_29 = arith.constant dense<0.000000e+00> : vector<8xf32>
    %41 = vector.multi_reduction <add>, %40, %cst_29 [1] : vector<8x8xf32> to vector<8xf32>
    %42 = vector.shape_cast %41 : vector<8xf32> to vector<8x1xf32>
    %43 = tpu.reciprocal %42 {approx = true} : vector<8x1xf32> -> vector<8x1xf32>
    %44 = vector.broadcast %43 : vector<8x1xf32> to vector<8x8xf32>
    %45 = arith.mulf %40, %44 : vector<8x8xf32>
    %46 = arith.truncf %45 : vector<8x8xf32> to vector<8x8xbf16>
    %47 = vector.extract_strided_slice %29 {offsets = [0, 0], sizes = [8, 8], strides = [1, 1]} : vector<8x32xbf16> to vector<8x8xbf16>
    %cst_30 = arith.constant dense<0.000000e+00> : vector<8x8xf32>
    %48 = tpu.matmul %46, %47, %cst_30 {dimension_numbers = #tpu.dot_dimension_numbers<[1], [0], [0], [1], [0, 0, 1, 1], [], []>} : vector<8x8xbf16>, vector<8x8xbf16>, vector<8x8xf32> -> vector<8x8xf32>
    %49 = arith.truncf %48 : vector<8x8xf32> to vector<8x8xbf16>
    %50 = vector.extract_strided_slice %31 {offsets = [0, 0], sizes = [8, 32], strides = [1, 1]} : vector<32x32xbf16> to vector<8x32xbf16>
    %cst_31 = arith.constant dense<0.000000e+00> : vector<8x32xf32>
    %51 = tpu.matmul %49, %50, %cst_31 {dimension_numbers = #tpu.dot_dimension_numbers<[1], [0], [0], [1], [0, 0, 1, 1], [], []>} : vector<8x8xbf16>, vector<8x32xbf16>, vector<8x32xf32> -> vector<8x32xf32>
    %52 = arith.addf %32, %51 : vector<8x32xf32>
    %53 = vector.extract_strided_slice %13 {offsets = [0, 8], sizes = [8, 8], strides = [1, 1]} : vector<8x32xbf16> to vector<8x8xbf16>
    %54 = vector.extract_strided_slice %21 {offsets = [0, 8], sizes = [8, 8], strides = [1, 1]} : vector<8x32xbf16> to vector<8x8xbf16>
    %cst_32 = arith.constant dense<0.000000e+00> : vector<8x8xf32>
    %55 = tpu.matmul %53, %54, %cst_32 {dimension_numbers = #tpu.dot_dimension_numbers<[1], [1], [0], [0], [0, 0, 1, 0], [], []>} : vector<8x8xbf16>, vector<8x8xbf16>, vector<8x8xf32> -> vector<8x8xf32>
    %cst_33 = arith.constant dense<0xFF800000> : vector<8xf32>
    %56 = vector.multi_reduction <maximumf>, %55, %cst_33 [1] : vector<8x8xf32> to vector<8xf32>
    %57 = vector.shape_cast %56 : vector<8xf32> to vector<8x1xf32>
    %58 = vector.broadcast %57 : vector<8x1xf32> to vector<8x8xf32>
    %59 = arith.subf %55, %58 : vector<8x8xf32>
    %60 = math.exp %59 : vector<8x8xf32>
    %cst_34 = arith.constant dense<0.000000e+00> : vector<8xf32>
    %61 = vector.multi_reduction <add>, %60, %cst_34 [1] : vector<8x8xf32> to vector<8xf32>
    %62 = vector.shape_cast %61 : vector<8xf32> to vector<8x1xf32>
    %63 = tpu.reciprocal %62 {approx = true} : vector<8x1xf32> -> vector<8x1xf32>
    %64 = vector.broadcast %63 : vector<8x1xf32> to vector<8x8xf32>
    %65 = arith.mulf %60, %64 : vector<8x8xf32>
    %66 = arith.truncf %65 : vector<8x8xf32> to vector<8x8xbf16>
    %67 = vector.extract_strided_slice %29 {offsets = [0, 8], sizes = [8, 8], strides = [1, 1]} : vector<8x32xbf16> to vector<8x8xbf16>
    %cst_35 = arith.constant dense<0.000000e+00> : vector<8x8xf32>
    %68 = tpu.matmul %66, %67, %cst_35 {dimension_numbers = #tpu.dot_dimension_numbers<[1], [0], [0], [1], [0, 0, 1, 1], [], []>} : vector<8x8xbf16>, vector<8x8xbf16>, vector<8x8xf32> -> vector<8x8xf32>
    %69 = arith.truncf %68 : vector<8x8xf32> to vector<8x8xbf16>
    %70 = vector.extract_strided_slice %31 {offsets = [8, 0], sizes = [8, 32], strides = [1, 1]} : vector<32x32xbf16> to vector<8x32xbf16>
    %cst_36 = arith.constant dense<0.000000e+00> : vector<8x32xf32>
    %71 = tpu.matmul %69, %70, %cst_36 {dimension_numbers = #tpu.dot_dimension_numbers<[1], [0], [0], [1], [0, 0, 1, 1], [], []>} : vector<8x8xbf16>, vector<8x32xbf16>, vector<8x32xf32> -> vector<8x32xf32>
    %72 = arith.addf %52, %71 : vector<8x32xf32>
    %73 = vector.extract_strided_slice %13 {offsets = [0, 16], sizes = [8, 8], strides = [1, 1]} : vector<8x32xbf16> to vector<8x8xbf16>
    %74 = vector.extract_strided_slice %21 {offsets = [0, 16], sizes = [8, 8], strides = [1, 1]} : vector<8x32xbf16> to vector<8x8xbf16>
    %cst_37 = arith.constant dense<0.000000e+00> : vector<8x8xf32>
    %75 = tpu.matmul %73, %74, %cst_37 {dimension_numbers = #tpu.dot_dimension_numbers<[1], [1], [0], [0], [0, 0, 1, 0], [], []>} : vector<8x8xbf16>, vector<8x8xbf16>, vector<8x8xf32> -> vector<8x8xf32>
    %cst_38 = arith.constant dense<0xFF800000> : vector<8xf32>
    %76 = vector.multi_reduction <maximumf>, %75, %cst_38 [1] : vector<8x8xf32> to vector<8xf32>
    %77 = vector.shape_cast %76 : vector<8xf32> to vector<8x1xf32>
    %78 = vector.broadcast %77 : vector<8x1xf32> to vector<8x8xf32>
    %79 = arith.subf %75, %78 : vector<8x8xf32>
    %80 = math.exp %79 : vector<8x8xf32>
    %cst_39 = arith.constant dense<0.000000e+00> : vector<8xf32>
    %81 = vector.multi_reduction <add>, %80, %cst_39 [1] : vector<8x8xf32> to vector<8xf32>
    %82 = vector.shape_cast %81 : vector<8xf32> to vector<8x1xf32>
    %83 = tpu.reciprocal %82 {approx = true} : vector<8x1xf32> -> vector<8x1xf32>
    %84 = vector.broadcast %83 : vector<8x1xf32> to vector<8x8xf32>
    %85 = arith.mulf %80, %84 : vector<8x8xf32>
    %86 = arith.truncf %85 : vector<8x8xf32> to vector<8x8xbf16>
    %87 = vector.extract_strided_slice %29 {offsets = [0, 16], sizes = [8, 8], strides = [1, 1]} : vector<8x32xbf16> to vector<8x8xbf16>
    %cst_40 = arith.constant dense<0.000000e+00> : vector<8x8xf32>
    %88 = tpu.matmul %86, %87, %cst_40 {dimension_numbers = #tpu.dot_dimension_numbers<[1], [0], [0], [1], [0, 0, 1, 1], [], []>} : vector<8x8xbf16>, vector<8x8xbf16>, vector<8x8xf32> -> vector<8x8xf32>
    %89 = arith.truncf %88 : vector<8x8xf32> to vector<8x8xbf16>
    %90 = vector.extract_strided_slice %31 {offsets = [16, 0], sizes = [8, 32], strides = [1, 1]} : vector<32x32xbf16> to vector<8x32xbf16>
    %cst_41 = arith.constant dense<0.000000e+00> : vector<8x32xf32>
    %91 = tpu.matmul %89, %90, %cst_41 {dimension_numbers = #tpu.dot_dimension_numbers<[1], [0], [0], [1], [0, 0, 1, 1], [], []>} : vector<8x8xbf16>, vector<8x32xbf16>, vector<8x32xf32> -> vector<8x32xf32>
    %92 = arith.addf %72, %91 : vector<8x32xf32>
    %93 = vector.extract_strided_slice %13 {offsets = [0, 24], sizes = [8, 8], strides = [1, 1]} : vector<8x32xbf16> to vector<8x8xbf16>
    %94 = vector.extract_strided_slice %21 {offsets = [0, 24], sizes = [8, 8], strides = [1, 1]} : vector<8x32xbf16> to vector<8x8xbf16>
    %cst_42 = arith.constant dense<0.000000e+00> : vector<8x8xf32>
    %95 = tpu.matmul %93, %94, %cst_42 {dimension_numbers = #tpu.dot_dimension_numbers<[1], [1], [0], [0], [0, 0, 1, 0], [], []>} : vector<8x8xbf16>, vector<8x8xbf16>, vector<8x8xf32> -> vector<8x8xf32>
    %cst_43 = arith.constant dense<0xFF800000> : vector<8xf32>
    %96 = vector.multi_reduction <maximumf>, %95, %cst_43 [1] : vector<8x8xf32> to vector<8xf32>
    %97 = vector.shape_cast %96 : vector<8xf32> to vector<8x1xf32>
    %98 = vector.broadcast %97 : vector<8x1xf32> to vector<8x8xf32>
    %99 = arith.subf %95, %98 : vector<8x8xf32>
    %100 = math.exp %99 : vector<8x8xf32>
    %cst_44 = arith.constant dense<0.000000e+00> : vector<8xf32>
    %101 = vector.multi_reduction <add>, %100, %cst_44 [1] : vector<8x8xf32> to vector<8xf32>
    %102 = vector.shape_cast %101 : vector<8xf32> to vector<8x1xf32>
    %103 = tpu.reciprocal %102 {approx = true} : vector<8x1xf32> -> vector<8x1xf32>
    %104 = vector.broadcast %103 : vector<8x1xf32> to vector<8x8xf32>
    %105 = arith.mulf %100, %104 : vector<8x8xf32>
    %106 = arith.truncf %105 : vector<8x8xf32> to vector<8x8xbf16>
    %107 = vector.extract_strided_slice %29 {offsets = [0, 24], sizes = [8, 8], strides = [1, 1]} : vector<8x32xbf16> to vector<8x8xbf16>
    %cst_45 = arith.constant dense<0.000000e+00> : vector<8x8xf32>
    %108 = tpu.matmul %106, %107, %cst_45 {dimension_numbers = #tpu.dot_dimension_numbers<[1], [0], [0], [1], [0, 0, 1, 1], [], []>} : vector<8x8xbf16>, vector<8x8xbf16>, vector<8x8xf32> -> vector<8x8xf32>
    %109 = arith.truncf %108 : vector<8x8xf32> to vector<8x8xbf16>
    %110 = vector.extract_strided_slice %31 {offsets = [24, 0], sizes = [8, 32], strides = [1, 1]} : vector<32x32xbf16> to vector<8x32xbf16>
    %cst_46 = arith.constant dense<0.000000e+00> : vector<8x32xf32>
    %111 = tpu.matmul %109, %110, %cst_46 {dimension_numbers = #tpu.dot_dimension_numbers<[1], [0], [0], [1], [0, 0, 1, 1], [], []>} : vector<8x8xbf16>, vector<8x32xbf16>, vector<8x32xf32> -> vector<8x32xf32>
    %112 = arith.addf %92, %111 : vector<8x32xf32>
    %c0_47 = arith.constant 0 : index
    %c0_48 = arith.constant 0 : index
    %c0_49 = arith.constant 0 : index
    %113 = vector.load %arg10[%c0_47, %c0_48, %c0_49] : memref<1x1x32xf32, #tpu.memory_space<vmem>>, vector<1x1x32xf32>
    %114 = vector.shape_cast %113 : vector<1x1x32xf32> to vector<1x32xf32>
    %115 = vector.broadcast %114 : vector<1x32xf32> to vector<8x32xf32>
    %116 = arith.addf %112, %115 : vector<8x32xf32>
    %117 = arith.addf %4, %116 : vector<8x32xf32>
    %c0_50 = arith.constant 0 : index
    %c0_51 = arith.constant 0 : index
    %c0_52 = arith.constant 0 : index
    %118 = vector.load %arg11[%c0_50, %c0_51, %c0_52] : memref<1x1x32xf32, #tpu.memory_space<vmem>>, vector<1x1x32xf32>
    %119 = vector.shape_cast %118 : vector<1x1x32xf32> to vector<1x32xf32>
    %c0_53 = arith.constant 0 : index
    %c0_54 = arith.constant 0 : index
    %c0_55 = arith.constant 0 : index
    %120 = vector.load %arg12[%c0_53, %c0_54, %c0_55] : memref<1x1x32xf32, #tpu.memory_space<vmem>>, vector<1x1x32xf32>
    %121 = vector.shape_cast %120 : vector<1x1x32xf32> to vector<1x32xf32>
    %cst_56 = arith.constant dense<0.000000e+00> : vector<8xf32>
    %122 = vector.multi_reduction <add>, %117, %cst_56 [1] : vector<8x32xf32> to vector<8xf32>
    %123 = vector.shape_cast %122 : vector<8xf32> to vector<8x1xf32>
    %cst_57 = arith.constant 3.200000e+01 : f32
    %124 = vector.broadcast %cst_57 : f32 to vector<8x1xf32>
    %125 = arith.divf %123, %124 : vector<8x1xf32>
    %126 = vector.broadcast %125 : vector<8x1xf32> to vector<8x32xf32>
    %127 = arith.subf %117, %126 : vector<8x32xf32>
    %128 = arith.mulf %127, %127 : vector<8x32xf32>
    %cst_58 = arith.constant dense<0.000000e+00> : vector<8xf32>
    %129 = vector.multi_reduction <add>, %128, %cst_58 [1] : vector<8x32xf32> to vector<8xf32>
    %130 = vector.shape_cast %129 : vector<8xf32> to vector<8x1xf32>
    %cst_59 = arith.constant 3.200000e+01 : f32
    %131 = vector.broadcast %cst_59 : f32 to vector<8x1xf32>
    %132 = arith.divf %130, %131 : vector<8x1xf32>
    %133 = vector.broadcast %125 : vector<8x1xf32> to vector<8x32xf32>
    %134 = arith.subf %117, %133 : vector<8x32xf32>
    %cst_60 = arith.constant 9.99999974E-6 : f32
    %135 = vector.broadcast %cst_60 : f32 to vector<8x1xf32>
    %136 = arith.addf %132, %135 : vector<8x1xf32>
    %137 = math.rsqrt %136 : vector<8x1xf32>
    %138 = vector.broadcast %137 : vector<8x1xf32> to vector<8x32xf32>
    %139 = arith.mulf %134, %138 : vector<8x32xf32>
    %140 = vector.broadcast %119 : vector<1x32xf32> to vector<8x32xf32>
    %141 = arith.mulf %139, %140 : vector<8x32xf32>
    %142 = vector.broadcast %121 : vector<1x32xf32> to vector<8x32xf32>
    %143 = arith.addf %141, %142 : vector<8x32xf32>
    %144 = arith.truncf %143 : vector<8x32xf32> to vector<8x32xbf16>
    %c0_61 = arith.constant 0 : index
    %c0_62 = arith.constant 0 : index
    %c0_63 = arith.constant 0 : index
    %145 = vector.load %arg13[%c0_61, %c0_62, %c0_63] : memref<1x32x64xbf16, #tpu.memory_space<vmem>>, vector<1x32x64xbf16>
    %146 = vector.shape_cast %145 : vector<1x32x64xbf16> to vector<32x64xbf16>
    %cst_64 = arith.constant dense<0.000000e+00> : vector<8x64xf32>
    %147 = tpu.matmul %144, %146, %cst_64 {dimension_numbers = #tpu.dot_dimension_numbers<[1], [0], [0], [1], [0, 0, 1, 1], [], []>} : vector<8x32xbf16>, vector<32x64xbf16>, vector<8x64xf32> -> vector<8x64xf32>
    %c0_65 = arith.constant 0 : index
    %c0_66 = arith.constant 0 : index
    %c0_67 = arith.constant 0 : index
    %148 = vector.load %arg14[%c0_65, %c0_66, %c0_67] : memref<1x1x64xf32, #tpu.memory_space<vmem>>, vector<1x1x64xf32>
    %149 = vector.shape_cast %148 : vector<1x1x64xf32> to vector<1x64xf32>
    %150 = vector.broadcast %149 : vector<1x64xf32> to vector<8x64xf32>
    %151 = arith.addf %147, %150 : vector<8x64xf32>
    %152 = arith.mulf %151, %151 : vector<8x64xf32>
    %153 = arith.mulf %151, %152 : vector<8x64xf32>
    %cst_68 = arith.constant 4.471500e-02 : f32
    %154 = vector.broadcast %cst_68 : f32 to vector<8x64xf32>
    %155 = arith.mulf %154, %153 : vector<8x64xf32>
    %156 = arith.addf %151, %155 : vector<8x64xf32>
    %cst_69 = arith.constant 0.797884583 : f32
    %157 = vector.broadcast %cst_69 : f32 to vector<8x64xf32>
    %158 = arith.mulf %157, %156 : vector<8x64xf32>
    %159 = math.tanh %158 : vector<8x64xf32>
    %cst_70 = arith.constant 1.000000e+00 : f32
    %160 = vector.broadcast %cst_70 : f32 to vector<8x64xf32>
    %161 = arith.addf %160, %159 : vector<8x64xf32>
    %cst_71 = arith.constant 5.000000e-01 : f32
    %162 = vector.broadcast %cst_71 : f32 to vector<8x64xf32>
    %163 = arith.mulf %162, %161 : vector<8x64xf32>
    %164 = arith.mulf %151, %163 : vector<8x64xf32>
    %165 = arith.truncf %164 : vector<8x64xf32> to vector<8x64xbf16>
    %c0_72 = arith.constant 0 : index
    %c0_73 = arith.constant 0 : index
    %c0_74 = arith.constant 0 : index
    %166 = vector.load %arg15[%c0_72, %c0_73, %c0_74] : memref<1x64x32xbf16, #tpu.memory_space<vmem>>, vector<1x64x32xbf16>
    %167 = vector.shape_cast %166 : vector<1x64x32xbf16> to vector<64x32xbf16>
    %cst_75 = arith.constant dense<0.000000e+00> : vector<8x32xf32>
    %168 = tpu.matmul %165, %167, %cst_75 {dimension_numbers = #tpu.dot_dimension_numbers<[1], [0], [0], [1], [0, 0, 1, 1], [], []>} : vector<8x64xbf16>, vector<64x32xbf16>, vector<8x32xf32> -> vector<8x32xf32>
    %c0_76 = arith.constant 0 : index
    %c0_77 = arith.constant 0 : index
    %c0_78 = arith.constant 0 : index
    %169 = vector.load %arg16[%c0_76, %c0_77, %c0_78] : memref<1x1x32xf32, #tpu.memory_space<vmem>>, vector<1x1x32xf32>
    %170 = vector.shape_cast %169 : vector<1x1x32xf32> to vector<1x32xf32>
    %171 = vector.broadcast %170 : vector<1x32xf32> to vector<8x32xf32>
    %172 = arith.addf %168, %171 : vector<8x32xf32>
    %173 = arith.addf %143, %172 : vector<8x32xf32>
    %c0_79 = arith.constant 0 : index
    %c0_80 = arith.constant 0 : index
    %c0_81 = arith.constant 0 : index
    %174 = vector.load %arg17[%c0_79, %c0_80, %c0_81] : memref<1x1x32xf32, #tpu.memory_space<vmem>>, vector<1x1x32xf32>
    %175 = vector.shape_cast %174 : vector<1x1x32xf32> to vector<1x32xf32>
    %c0_82 = arith.constant 0 : index
    %c0_83 = arith.constant 0 : index
    %c0_84 = arith.constant 0 : index
    %176 = vector.load %arg18[%c0_82, %c0_83, %c0_84] : memref<1x1x32xf32, #tpu.memory_space<vmem>>, vector<1x1x32xf32>
    %177 = vector.shape_cast %176 : vector<1x1x32xf32> to vector<1x32xf32>
    %cst_85 = arith.constant dense<0.000000e+00> : vector<8xf32>
    %178 = vector.multi_reduction <add>, %173, %cst_85 [1] : vector<8x32xf32> to vector<8xf32>
    %179 = vector.shape_cast %178 : vector<8xf32> to vector<8x1xf32>
    %cst_86 = arith.constant 3.200000e+01 : f32
    %180 = vector.broadcast %cst_86 : f32 to vector<8x1xf32>
    %181 = arith.divf %179, %180 : vector<8x1xf32>
    %182 = vector.broadcast %181 : vector<8x1xf32> to vector<8x32xf32>
    %183 = arith.subf %173, %182 : vector<8x32xf32>
    %184 = arith.mulf %183, %183 : vector<8x32xf32>
    %cst_87 = arith.constant dense<0.000000e+00> : vector<8xf32>
    %185 = vector.multi_reduction <add>, %184, %cst_87 [1] : vector<8x32xf32> to vector<8xf32>
    %186 = vector.shape_cast %185 : vector<8xf32> to vector<8x1xf32>
    %cst_88 = arith.constant 3.200000e+01 : f32
    %187 = vector.broadcast %cst_88 : f32 to vector<8x1xf32>
    %188 = arith.divf %186, %187 : vector<8x1xf32>
    %189 = vector.broadcast %181 : vector<8x1xf32> to vector<8x32xf32>
    %190 = arith.subf %173, %189 : vector<8x32xf32>
    %cst_89 = arith.constant 9.99999974E-6 : f32
    %191 = vector.broadcast %cst_89 : f32 to vector<8x1xf32>
    %192 = arith.addf %188, %191 : vector<8x1xf32>
    %193 = math.rsqrt %192 : vector<8x1xf32>
    %194 = vector.broadcast %193 : vector<8x1xf32> to vector<8x32xf32>
    %195 = arith.mulf %190, %194 : vector<8x32xf32>
    %196 = vector.broadcast %175 : vector<1x32xf32> to vector<8x32xf32>
    %197 = arith.mulf %195, %196 : vector<8x32xf32>
    %198 = vector.broadcast %177 : vector<1x32xf32> to vector<8x32xf32>
    %199 = arith.addf %197, %198 : vector<8x32xf32>
    %c0_90 = arith.constant 0 : index
    %c0_91 = arith.constant 0 : index
    %c0_92 = arith.constant 0 : index
    %200 = vector.load %arg19[%c0_90, %c0_91, %c0_92] : memref<1x8x32xf32, #tpu.memory_space<vmem>>, vector<1x8x32xf32>
    %201 = vector.shape_cast %200 : vector<1x8x32xf32> to vector<8x32xf32>
    %202 = vector.shape_cast %199 : vector<8x32xf32> to vector<1x8x32xf32>
    tpu.vector_store %arg19[%c0_90, %c0_91, %c0_92], %202 {strides = array<i32>} : memref<1x8x32xf32, #tpu.memory_space<vmem>>, vector<1x8x32xf32>,
    return
  }
  func.func @transform_0(%arg0: i32, %arg1: i32) -> (i32, i32, i32) {
    %c0_i32 = arith.constant 0 : i32
    %c0_i32_0 = arith.constant 0 : i32
    %c0_i32_1 = arith.constant 0 : i32
    return %arg0, %c0_i32, %c0_i32_0 : i32, i32, i32
  }
  func.func @transform_1(%arg0: i32, %arg1: i32) -> (i32, i32, i32) {
    %c0_i32 = arith.constant 0 : i32
    %c0_i32_0 = arith.constant 0 : i32
    %c0_i32_1 = arith.constant 0 : i32
    return %arg1, %c0_i32, %c0_i32_0 : i32, i32, i32
  }
  func.func @transform_2(%arg0: i32, %arg1: i32) -> (i32, i32, i32) {
    %c0_i32 = arith.constant 0 : i32
    %c0_i32_0 = arith.constant 0 : i32
    %c0_i32_1 = arith.constant 0 : i32
    return %arg1, %c0_i32, %c0_i32_0 : i32, i32, i32
  }
  func.func @transform_3(%arg0: i32, %arg1: i32) -> (i32, i32, i32) {
    %c0_i32 = arith.constant 0 : i32
    %c0_i32_0 = arith.constant 0 : i32
    %c0_i32_1 = arith.constant 0 : i32
    return %arg1, %c0_i32, %c0_i32_0 : i32, i32, i32
  }
  func.func @transform_4(%arg0: i32, %arg1: i32) -> (i32, i32, i32) {
    %c0_i32 = arith.constant 0 : i32
    %c0_i32_0 = arith.constant 0 : i32
    %c0_i32_1 = arith.constant 0 : i32
    return %arg1, %c0_i32, %c0_i32_0 : i32, i32, i32
  }
  func.func @transform_5(%arg0: i32, %arg1: i32) -> (i32, i32, i32) {
    %c0_i32 = arith.constant 0 : i32
    %c0_i32_0 = arith.constant 0 : i32
    %c0_i32_1 = arith.constant 0 : i32
    return %arg1, %c0_i32, %c0_i32_0 : i32, i32, i32
  }
  func.func @transform_6(%arg0: i32, %arg1: i32) -> (i32, i32, i32) {
    %c0_i32 = arith.constant 0 : i32
    %c0_i32_0 = arith.constant 0 : i32
    %c0_i32_1 = arith.constant 0 : i32
    return %arg1, %c0_i32, %c0_i32_0 : i32, i32, i32
  }
  func.func @transform_7(%arg0: i32, %arg1: i32) -> (i32, i32, i32) {
    %c0_i32 = arith.constant 0 : i32
    %c0_i32_0 = arith.constant 0 : i32
    %c0_i32_1 = arith.constant 0 : i32
    return %arg1, %c0_i32, %c0_i32_0 : i32, i32, i32
  }
  func.func @transform_8(%arg0: i32, %arg1: i32) -> (i32, i32, i32) {
    %c0_i32 = arith.constant 0 : i32
    %c0_i32_0 = arith.constant 0 : i32
    %c0_i32_1 = arith.constant 0 : i32
    return %arg1, %c0_i32, %c0_i32_0 : i32, i32, i32
  }
  func.func @transform_9(%arg0: i32, %arg1: i32) -> (i32, i32, i32) {
    %c0_i32 = arith.constant 0 : i32
    %c0_i32_0 = arith.constant 0 : i32
    %c0_i32_1 = arith.constant 0 : i32
    return %arg1, %c0_i32, %c0_i32_0 : i32, i32, i32
  }
  func.func @transform_10(%arg0: i32, %arg1: i32) -> (i32, i32, i32) {
    %c0_i32 = arith.constant 0 : i32
    %c0_i32_0 = arith.constant 0 : i32
    %c0_i32_1 = arith.constant 0 : i32
    return %arg1, %c0_i32, %c0_i32_0 : i32, i32, i32
  }
  func.func @transform_11(%arg0: i32, %arg1: i32) -> (i32, i32, i32) {
    %c0_i32 = arith.constant 0 : i32
    %c0_i32_0 = arith.constant 0 : i32
    %c0_i32_1 = arith.constant 0 : i32
    return %arg1, %c0_i32, %c0_i32_0 : i32, i32, i32
  }
  func.func @transform_12(%arg0: i32, %arg1: i32) -> (i32, i32, i32) {
    %c0_i32 = arith.constant 0 : i32
    %c0_i32_0 = arith.constant 0 : i32
    %c0_i32_1 = arith.constant 0 : i32
    return %arg1, %c0_i32, %c0_i32_0 : i32, i32, i32
  }
  func.func @transform_13(%arg0: i32, %arg1: i32) -> (i32, i32, i32) {
    %c0_i32 = arith.constant 0 : i32
    %c0_i32_0 = arith.constant 0 : i32
    %c0_i32_1 = arith.constant 0 : i32
    return %arg1, %c0_i32, %c0_i32_0 : i32, i32, i32
  }
  func.func @transform_14(%arg0: i32, %arg1: i32) -> (i32, i32, i32) {
    %c0_i32 = arith.constant 0 : i32
    %c0_i32_0 = arith.constant 0 : i32
    %c0_i32_1 = arith.constant 0 : i32
    return %arg1, %c0_i32, %c0_i32_0 : i32, i32, i32
  }
  func.func @transform_15(%arg0: i32, %arg1: i32) -> (i32, i32, i32) {
    %c0_i32 = arith.constant 0 : i32
    %c0_i32_0 = arith.constant 0 : i32
    %c0_i32_1 = arith.constant 0 : i32
    return %arg1, %c0_i32, %c0_i32_0 : i32, i32, i32
  }
  func.func @transform_16(%arg0: i32, %arg1: i32) -> (i32, i32, i32) {
    %c0_i32 = arith.constant 0 : i32
    %c0_i32_0 = arith.constant 0 : i32
    %c0_i32_1 = arith.constant 0 : i32
    return %arg1, %c0_i32, %c0_i32_0 : i32, i32, i32
  }
  func.func @transform_17(%arg0: i32, %arg1: i32) -> (i32, i32, i32) {
    %c0_i32 = arith.constant 0 : i32
    %c0_i32_0 = arith.constant 0 : i32
    %c0_i32_1 = arith.constant 0 : i32
    return %arg0, %c0_i32, %c0_i32_0 : i32, i32, i32
  }
}

</mosaic_0001>

<bundles_post_ra>
// kernel: tpu_custom_call.1
= control target key start
LH: loop header
LB: loop body
LE: loop exit
PB: predicated region body
PF: predicated region fallthrough
CT: control target
= control target key end

     0   :  { %s3010_s0 = inlined_call_operand.hbm [shape: f32[2,8,32], index: 0, kind: input, shape index: {}]   ;;  %s3011_s1 = inlined_call_operand.vmem [shape: bf16[2,32,32], index: 1, kind: input, shape index: {}]   ;;  %s3012_s2 = inlined_call_operand.hbm [shape: f32[2,1,32], index: 2, kind: input, shape index: {}]   ;;  %s3013_s3 = inlined_call_operand.vmem [shape: bf16[2,32,32], index: 3, kind: input, shape index: {}]   ;;  %s3014_s4 = inlined_call_operand.vmem [shape: f32[2,1,32], index: 4, kind: input, shape index: {}]   ;;  %s3015_s5 = inlined_call_operand.vmem [shape: bf16[2,32,32], index: 5, kind: input, shape index: {}]   ;;  %s3016_s6 = inlined_call_operand.vmem [shape: f32[2,1,32], index: 6, kind: input, shape index: {}]   ;;  %s3017_s7 = inlined_call_operand.hbm [shape: bf16[2,32,32], index: 7, kind: input, shape index: {}]   ;;  %s3018_s8 = inlined_call_operand.vmem [shape: f32[2,1,32], index: 8, kind: input, shape index: {}]   ;;  %s3019_s9 = inlined_call_operand.hbm [shape: f32[2,1,32], index: 9, kind: input, shape index: {}]   ;;  %s3020_s10 = inlined_call_operand.vmem [shape: f32[2,1,32], index: 10, kind: input, shape index: {}]   ;;  %s3021_s11 = inlined_call_operand.hbm [shape: bf16[2,32,64], index: 11, kind: input, shape index: {}]   ;;  %s3022_s12 = inlined_call_operand.vmem [shape: f32[2,1,64], index: 12, kind: input, shape index: {}]   ;;  %s3023_s13 = inlined_call_operand.vmem [shape: bf16[2,64,32], index: 13, kind: input, shape index: {}]   ;;  %s3024_s14 = inlined_call_operand.vmem [shape: f32[2,1,32], index: 14, kind: input, shape index: {}]   ;;  %s3025_s15 = inlined_call_operand.hbm [shape: f32[2,1,32], index: 15, kind: input, shape index: {}]   ;;  %s3026_s16 = inlined_call_operand.vmem [shape: f32[2,1,32], index: 16, kind: input, shape index: {}]   ;;  %s3027_s17 = inlined_call_operand.hbm [shape: f32[2,8,32], index: 17, kind: output, shape index: {}]  }
   0x1   :  { %3048 = sst [smem:[#allocation36_spill]] %s3010_s0 }
   0x2   :  { %3049 = sst [smem:[#allocation37_spill]] %s3011_s1 }
   0x3   :  { %3050 = sst [smem:[#allocation38_spill]] %s3012_s2 }
   0x4   :  { %3051 = sst [smem:[#allocation39_spill]] %s3013_s3 }
   0x5   :  { %3052 = sst [smem:[#allocation40_spill]] %s3014_s4 }
   0x6   :  { %3053 = sst [smem:[#allocation41_spill]] %s3015_s5 }
   0x7   :  { %3054 = sst [smem:[#allocation42_spill]] %s3016_s6 }
   0x8   :  { %3055 = sst [smem:[#allocation43_spill]] %s3017_s7 }
   0x9   :  { %3056 = sst [smem:[#allocation44_spill]] %s3018_s8 }
   0xa   :  { %3057 = sst [smem:[#allocation45_spill]] %s3019_s9 }
   0xb   :  { %3058 = sst [smem:[#allocation46_spill]] %s3020_s10 }
   0xc   :  { %3059 = sst [smem:[#allocation47_spill]] %s3021_s11 }
   0xd   :  { %3060 = sst [smem:[#allocation48_spill]] %s3022_s12 }
   0xe   :  { %3061 = sst [smem:[#allocation49_spill]] %s3023_s13 }
   0xf   :  { %3062 = sst [smem:[#allocation50_spill]] %s3024_s14 }
  0x10   :  { %3063 = sst [smem:[#allocation51_spill]] %s3025_s15 }
  0x11   :  { %3064 = sst [smem:[#allocation52_spill]] %s3026_s16 }
  0x12   :  { %3065 = sst [smem:[#allocation53_spill]] %s3027_s17 }
  0x13   :  { %22 = vsyncpa [#allocation3], 0 }
  0x14   :  { %24 = vsyncpa [#allocation3 + $0x1], 0 }
  0x15   :  { %25 = vsyncpa [#allocation6], 0 }
  0x16   :  { %27 = vsyncpa [#allocation6 + $0x1], 0 }
  0x17   :  { %28 = vsyncpa [#allocation9], 0 }
  0x18   :  { %30 = vsyncpa [#allocation9 + $0x1], 0 }
  0x19   :  { %31 = vsyncpa [#allocation12], 0 }
  0x1a   :  { %33 = vsyncpa [#allocation12 + $0x1], 0 }
  0x1b   :  { %34 = vsyncpa [#allocation4], 0 }
  0x1c   :  { %36 = vsyncpa [#allocation4 + $0x1], 0  ;;  %s2546_s24 = smov 0   ;;  %s2548_s25 = smov 0  }
  0x1d   :  { %s2550_s26 = smov 0   ;;  %s2552_s27 = smov 0  }
  0x1e   :  { %s2554_s28 = smov 0   ;;  %s2556_s29 = smov 0  }
  0x1f   :  { %s2558_s0 = smov 0   ;;  %s2560_s30 = smov 0  }
  0x20   :  { %s2562_s18 = smov 0   ;;  %s2564_s19 = smov 0  }
  0x21   :  { %s2566_s1 = smov 0  }
  0x22 LB: > { %3066 = sst [smem:[#allocation19_spill]] %s2412_s25  ;;  %p69_p0 = scmp.eq.s32.totalorder %s2448_s1, 0  ;;  %s2448_s1 = sphi %s2566_s1, %s42_s1   ;;  %s2444_s19 = sphi %s2564_s19, %s3140_s19   ;;  %s2440_s18 = sphi %s2562_s18, %s3139_s18   ;;  %s2436_s30 = sphi %s2560_s30, %s3138_s30   ;;  %s2432_s0 = sphi %s2558_s0, %s3137_s0   ;;  %s2428_s29 = sphi %s2556_s29, %s3136_s29   ;;  %s2424_s28 = sphi %s2554_s28, %s3135_s28   ;;  %s2420_s27 = sphi %s2552_s27, %s3134_s27   ;;  %s2416_s26 = sphi %s2550_s26, %s3133_s26   ;;  %s2412_s25 = sphi %s2548_s25, %s3132_s25   ;;  %s2408_s24 = sphi %s2546_s24, %s3131_s24  }
  0x23   : > { %3067 = sst [smem:[#allocation20_spill]] %s2416_s26  ;;  %p120_p1 = scmp.ne.s32.totalorder %s2416_s26, %s2412_s25 }
  0x24   : > { %3068 = sst [smem:[#allocation21_spill]] %s2420_s27  ;;  %p126_p2 = scmp.ne.s32.totalorder %s2412_s25, %s2408_s24 }
  0x25   : > { %3069 = sst [smem:[#allocation22_spill]] %s2424_s28  ;;  %p3029_p3 = scmp.lt.s32.totalorder %s2448_s1, 4 }
  0x26   : > { %3070 = sst [smem:[#allocation23_spill]] %s2428_s29  ;;  %p122_p4 = por %p120_p1, %p69_p0 }
  0x27   : > { %3071 = sst [smem:[#allocation24_spill]] %s2432_s0  ;;  %s567_s21 = sand.u32 1, %s2448_s1  }
  0x28   : > { %3072 = sst [smem:[#allocation25_spill]] %s2436_s30  ;;  %s2612_s22 = sand.u32 1, %s2416_s26  }
  0x29   : > { %3073 = sst [smem:[#allocation26_spill]] %s2440_s18  ;;  %s570_s14 = scalar_lea.vmem [#allocation5], %s2612_s22 }
  0x2a   : > { %3074 = sst [smem:[#allocation27_spill]] %s2444_s19  ;;  %s577_s13 = sshll.u32 %s570_s14, 4  ;;  %s578_s13 = int_to_ptr.vmem [resolvable:$true] %s577_s13 }
  0x2b   : > { %3075 = sst [smem:[#allocation28_spill]] %s2448_s1  ;;  %p2621_p5 = pnand %p3029_p3, %p122_p4 }
  0x2c   : > { %s3076_s2 = sld [smem:[#allocation38_spill]]  ;;  %p1866_p6 = scmp.ge.s32.totalorder %s2448_s1, 1 }
  0x2d   : > { %p726_p7 = scmp.lt.s32.totalorder %s2448_s1, 5  ;;  %s2627_s17 = scalar_lea.sflag [#allocation6], %s567_s21 }
  0x2e   : > { %s3079_s9 = sld [smem:[#allocation45_spill]]  ;;  %s643_s10 = scalar_lea.vmem [#allocation8], %s2612_s22 }
  0x2f   : > { %p2632_p8 = pnand %p1866_p6, %p726_p7  ;;  %s650_s8 = sshll.u32 %s643_s10, 4  ;;  %s651_s8 = int_to_ptr.vmem [resolvable:$true] %s650_s8 }
  0x30   : > { %s54_s23 = sadd.s32 1, %s2444_s19  ;;  %s61_s10 = sadd.s32 1, %s2428_s29 }
  0x31   : > { %p68_p10 = scmp.ne.s32.totalorder %s2428_s29, %s2424_s28  ;;  %p74_p11 = scmp.ne.s32.totalorder %s2424_s28, %s2420_s27 }
  0x32   : > { %s573_s30 = scalar_lea.hbm %s3076_s2, %s2440_s18  ;;  %s3093_s4 = sld [smem:[#allocation36_spill]] }
  0x33   : > { %s575_s16 = sshll.u32 %s573_s30, 4  ;;  %s51_s30 = sadd.s32 1, %s2440_s18  ;;  %s576_s16 = int_to_ptr.hbm [resolvable:$true] %s575_s16 }
  0x34   : > { %1987 = dma.hbm_to_vmem [thread:$0]  (!%p2621_p5), %s576_s16, 16, %s578_s13, %s2627_s17  }
  0x35   : > { %s646_s2 = scalar_lea.hbm %s3079_s9, %s2440_s18  ;;  %s2641_s13 = scalar_lea.sflag [#allocation9], %s567_s21 }
  0x36   : > { %s648_s12 = sshll.u32 %s646_s2, 4  ;;  %s2647_s16 = sadd.s32 4294967295, %s2448_s1   ;;  %s649_s12 = int_to_ptr.hbm [resolvable:$true] %s648_s12 }
  0x37   : > { %1993 = dma.hbm_to_vmem [thread:$0]  (!%p2621_p5), %s649_s12, 16, %s651_s8, %s2641_s13  }
  0x38   : > { %s1855_s2 = sadd.s32 4294967294, %s2448_s1   ;;  %p52_p9 = scmp.ge.s32.totalorder %s51_s30, 2 }
  0x39   : > { %p2665_p12 = por %p69_p0, %p68_p10  ;;  %p75_p13 = scmp.eq.s32.totalorder %s2647_s16, 0 }
  0x3a   : > { %s3142_s30 = smov (%p52_p9, %s51_s30), 0  ;;  %s3144_s23 = smov (!%p52_p9, %s54_s23), %s2444_s19 }
  0x3b   : > { %3080 = sst [smem:[#allocation29_spill]] %s3142_s30  ;;  %p56_p1 = scmp.ge.s32.totalorder %s3144_s23, 2 }
  0x3c   : > { %s110_s12 = ssub.s32 %s2440_s18, %s3142_s30  ;;  %p2675_p4 = por %p75_p13, %p74_p11 }
  0x3d   : > { %p111_p6 = scmp.eq.s32.totalorder %s110_s12, 0  ;;  %s3146_s23 = smov (%p56_p1, %s3144_s23), 0 }
  0x3e   : > { %3083 = sst [smem:[#allocation30_spill]] %s3146_s23  ;;  %s3084_s9 = sadd.s32 1, %s2416_s26 }
  0x3f   : > { %s2684_s6 = scalar_select %p111_p6, %s2416_s26, %s3084_s9  }
  0x40   : > { %s58_s5 = ssub.s32 %s2444_s19, %s3146_s23  ;;  %p2691_p0 = por %p126_p2, %p75_p13 }
  0x41   : > { %3085 = sst [smem:[#allocation31_spill]] %s2684_s6  ;;  %p59_p7 = scmp.eq.s32.totalorder %s58_s5, 0 }
  0x42   : > { %s3086_s3 = scalar_select %p2691_p0, 1, 0 }
  0x43   : > { %p514_p9 = scmp.eq.s32.totalorder %s2647_s16, 3  ;;  %p520_p3 = scmp.eq.s32.totalorder %s1855_s2, 3 }
  0x44   : > { %3087 = sst [smem:[#allocation32_spill]] %s3086_s3  ;;  %s540_s12 = sand.u32 1, %s2428_s29  }
  0x45   : > { %s2698_s30 = scalar_select %p59_p7, %s2428_s29, %s61_s10  }
  0x46   : > { %p2703_p1 = por %p514_p9, %p68_p10  ;;  %p2710_p2 = por %p520_p3, %p74_p11 }
  0x47   : > { %3088 = sst [smem:[#allocation33_spill]] %s2698_s30  ;;  %s1858_s23 = sshll.u32 %s540_s12, 3 }
  0x48   : > { %s3089_s9 = scalar_select %p2703_p1, 1, 0 }
  0x49   : > { %s3091_s24 = scalar_select %p2710_p2, 1, 0 }
  0x4a   : > { %3090 = sst [smem:[#allocation34_spill]] %s3089_s9  ;;  %s1859_s6 = sshll.u32 %s2444_s19, 3 }
  0x4b   : > { %3092 = sst [smem:[#allocation35_spill]] %s3091_s24  ;;  %s548_s0 = scalar_lea.hbm %s3093_s4, %s1859_s6 }
  0x4c   : > { %s544_s2 = scalar_lea.vmem [#allocation2], %s1858_s23  ;;  %s550_s10 = sshll.u32 %s548_s0, 4  ;;  %s551_s10 = int_to_ptr.hbm [resolvable:$true] %s550_s10 }
  0x4d   : > { %s552_s3 = sshll.u32 %s544_s2, 4  ;;  %p3094_p10 = scmp.lt.s32.totalorder %s2448_s1, 4  ;;  %s553_s3 = int_to_ptr.vmem [resolvable:$true] %s552_s3 }
  0x4e   : > { %s1860_s30 = sshll.u32 %s2612_s22, 4  ;;  %s1949_s29 = sshll.u32 %s2440_s18, 4 }
  0x4f   : > { %p1982_p13 = pnand %p3094_p10, %p2665_p12  ;;  %s541_s27 = scalar_lea.sflag [#allocation3], %s540_s12 }
  0x50   : > { %s3095_s7 = sld [smem:[#allocation43_spill]]  ;;  %s616_s6 = scalar_lea.vmem [#allocation7], %s1860_s30 }
  0x51   : > { %1984 = dma.hbm_to_vmem [thread:$0]  (!%p1982_p13), %s551_s10, 128, %s553_s3, %s541_s27  }
  0x52   : > { %s624_s26 = sshll.u32 %s616_s6, 4  ;;  %s2450_s23 = smov 64   ;;  %s625_s26 = int_to_ptr.vmem [resolvable:$true] %s624_s26 }
  0x53   : > { %s2451_s8 = smov 4   ;;  %s3096_s11 = sld [smem:[#allocation47_spill]] }
  0x54   : > { %s667_s12 = scalar_lea.vmem [#allocation10], %s1860_s30  ;;  %s3097_s15 = sld [smem:[#allocation51_spill]] }
  0x55   : > { %s675_s24 = sshll.u32 %s667_s12, 4  ;;  %s676_s24 = int_to_ptr.vmem [resolvable:$true] %s675_s24 }
  0x56   : > { %s621_s4 = scalar_lea.hbm %s3095_s7, %s1949_s29  ;;  %s708_s7 = scalar_lea.vmem [#allocation11], %s2612_s22 }
  0x57   : > { %s622_s0 = sshll.u32 %s621_s4, 4  ;;  %s715_s1 = sshll.u32 %s708_s7, 4  ;;  %s623_s0 = int_to_ptr.hbm [resolvable:$true] %s622_s0  ;;  %s716_s1 = int_to_ptr.vmem [resolvable:$true] %s715_s1 }
  0x58   : > { %1990 = dma.hbm_to_vmem [thread:$0]  (!%p2621_p5), %s623_s0, 256, %s625_s26, %s2627_s17, %s2450_s23, %s2450_s23, %s2451_s8  }
  0x59   : > { %s672_s19 = scalar_lea.hbm %s3096_s11, %s1949_s29  ;;  %s706_s17 = scalar_lea.sflag [#allocation12], %s2612_s22 }
  0x5a   : > { %s673_s5 = sshll.u32 %s672_s19, 4  ;;  %s711_s4 = scalar_lea.hbm %s3097_s15, %s2440_s18  ;;  %s674_s5 = int_to_ptr.hbm [resolvable:$true] %s673_s5 }
  0x5b   : > { %1996 = dma.hbm_to_vmem [thread:$0]  (!%p2621_p5), %s674_s5, 256, %s676_s24, %s2641_s13, %s2450_s23, %s2450_s23, %s2451_s8  }
  0x5c   : > { %s713_s6 = sshll.u32 %s711_s4, 4  ;;  %730 = sbr.rel (%p2632_p8) target bundleno = 2297 (0x8f9), region = 88  ;;  %s714_s6 = int_to_ptr.hbm [resolvable:$true] %s713_s6 }
  0x5d   : > { %1999 = dma.hbm_to_vmem [thread:$0]  (!%p2621_p5), %s714_s6, 16, %s716_s1, %s706_s17  }
  0x5e   : > { %s2747_s29 = sand.u32 (!%p2632_p8), 1, %s2424_s28  }
  0x5f   : > { %s3042_s13 = sshll.u32 (!%p2632_p8), %s2747_s29, 3  ;;  %s733_s30 = scalar_lea.sflag (!%p2632_p8), [#allocation3], %s2747_s29 }
  0x60   : > { %s2753_s26 = scalar_lea.vmem (!%p2632_p8), [#allocation2], %s3042_s13 }
  0x61   : > { %2387 = dma.done.wait (%p2675_p4), %s733_s30, 128  }
  0x62   : > { %2389 = vsyncadd (%p2675_p4), %s733_s30, 4294967168  ;;  %s742_s1 = sand.u32 1, %s2647_s16   ;;  %s2761_s20 = sand.u32 1, %s2412_s25  }
  0x63   : > { %s743_s22 = scalar_lea.sflag [#allocation6], %s742_s1 }
  0x64   : > { %2391 = dma.done.wait (%p2691_p0), %s743_s22, 272  }
  0x65   : > { %2393 = vsyncadd (%p2691_p0), %s743_s22, 4294967024  ;;  %s1868_s0 = sshll.u32 %s2761_s20, 4  ;;  %s762_s23 = scalar_lea.sflag [#allocation9], %s742_s1 }
  0x66   : > { %s2769_s21 = scalar_lea.vmem [#allocation7], %s1868_s0 }
  0x67   : > { %2395 = dma.done.wait (%p2691_p0), %s762_s23, 272  }
  0x68   : > { %2397 = vsyncadd (%p2691_p0), %s762_s23, 4294967024  ;;  %s2776_s16 = scalar_lea.vmem [#allocation10], %s1868_s0  ;;  %s781_s3 = scalar_lea.sflag [#allocation12], %s2761_s20 }
  0x69   : > { %2399 = dma.done.wait (%p2691_p0), %s781_s3, 16  }
  0x6a   : > { %2401 = vsyncadd (%p2691_p0), %s781_s3, 4294967280  ;;  %s3099_s19 = sld [smem:[#allocation24_spill]]  ;;  %s3111_s4 = sshll.u32 %s2747_s29, 3 }
  0x6b   : > { %s3101_s30 = sld [smem:[#allocation37_spill]]  ;;  %s2836_s6 = scalar_lea.vmem [#allocation13], %s3111_s4 }
  0x6c   : > { %s3102_s0 = sld [smem:[#allocation39_spill]] }
  0x6d   : > { %s3103_s8 = sld [smem:[#allocation41_spill]] }
  0x6e   : > { %s3106_s17 = sld [smem:[#allocation46_spill]] }
  0x6f   : > { %s3107_s22 = sld [smem:[#allocation48_spill]] }
  0x70   : > { %p898_p3 = scmp.lt.s32.totalorder %s3099_s19, 1  ;;  %s3109_s13 = sld [smem:[#allocation50_spill]] }
  0x71   : > { %s3110_s2 = sld [smem:[#allocation52_spill]]  ;;  %p1879_p5 = scmp.ne.s32.totalorder %s3099_s19, 0 }
  0x72   : > { %s2786_s12 = scalar_select %p898_p3, %s3099_s19, 1 }
  0x74   : > { %s1951_s24 = sshll.u32 %s2786_s12, 4  ;;  %s1954_s9 = sshll.u32 %s2786_s12, 5 }
  0x75   : > { %s902_s7 = scalar_lea.vmem %s3101_s30, %s1951_s24  ;;  %s907_s23 = scalar_lea.vmem %s3102_s0, %s1951_s24 }
  0x76   : > { %s2802_s14 = scalar_lea.vmem %s3103_s8, %s1951_s24  ;;  %s924_s30 = scalar_lea.vmem %s3106_s17, %s2786_s12 }
  0x77   : > { %s927_s0 = scalar_lea.vmem %s3107_s22, %s2786_s12  ;;  %s3108_s24 = sld [smem:[#allocation49_spill]] }
  0x78   : > { %s935_s18 = scalar_lea.vmem %s3109_s13, %s2786_s12  ;;  %s938_s10 = scalar_lea.vmem %s3110_s2, %s2786_s12 }
  0x79   : > { %943 = sbr.rel (%p1879_p5) target bundleno = 128 (0x80), region = 116 }
  0x7d   : > { %s2824_s3 = scalar_lea.vmem %s3108_s24, %s1954_s9 }
  0x7e   : > { %v944_v0 = vld [vmem:[%s2753_s26] sm:$0xff]  ;;  %vm945_vm0 = vcmask 261120  }
  0x7f   : > { %946 = vst.msk [vmem:[%s2836_s6] sm:$0xff] %vm945_vm0, %v944_v0 }
  0x80 PF: > { %v1956_v1 = vld [vmem:[%s902_s7 + $0x8] sm:$0xff]  ;;  %v1955_v3 = vld [vmem:[%s902_s7] sm:$0xff]  ;;  %vm969_vm1 = vcmask 261120   ;;  %s3112_s25 = scalar_lea.vmem [#allocation5], %s2761_s20  ;;  %s3113_s19 = sld [smem:[#allocation40_spill]]  ;;  %vm1059_vm2 = vcmask 64512  }
  0x81   : > { %v1958_v2 = vld [vmem:[%s907_s23 + $0x8] sm:$0xff]  ;;  %v1957_v4 = vld [vmem:[%s907_s23] sm:$0xff]  ;;  %979 = vmatpush.bf16.msra.mxu0 %v1956_v1  ;;  %s2452_s23 = smov 112   ;;  %s2453_s17 = smov 120   ;;  %vm1094_vm3 = vcmask 1043456   ;;  %vm1498_vm8 = vcmask 523264  }
  0x82   : > { %1013 = vmatpush.bf16.msra.mxu1 %v1958_v2  ;;  %v2100_v7 = vld [vmem:[%s3112_s25] ss:$0 sm:$0xff]  ;;  %s2454_s1 = smov 104   ;;  %v1960_v22 = vld [vmem:[%s2802_s14 + $0x8] sm:$0xff]  ;;  %s3115_s27 = sld [smem:[#allocation42_spill]] }
  0x83   : > { %1047 = vmatpush.bf16.msra.mxu2 %v1960_v22  ;;  %v1959_v24 = vld [vmem:[%s2802_s14] sm:$0xff]  ;;  %s3117_s15 = sld [smem:[#allocation44_spill]]  ;;  %s3124_s26 = scalar_lea.vmem [#allocation11], %s2761_s20 }
  0x84   : > { %v1055_v52 = vld [vmem:[%s2769_s21] sm:$0xf]  ;;  %s3123_s9 = sld [smem:[#allocation25_spill]] }
  0x85   : > { %980 = vmatpush.bf16.msra.mxu0 %v1955_v3  ;;  %v1201_v53 = vsel %vm1094_vm3, %v1055_v52, 0 }
  0x86   : > { %v2842_v5 = vld [vmem:[%s2836_s6] sm:$0xff]  ;;  %1014 = vmatpush.bf16.msra.mxu1 %v1957_v4  ;;  %s3114_s7 = scalar_lea.vmem %s3113_s19, %s2786_s12 }
  0x87   : > { %v948_v6 = vpack.c.bf16 %v2842_v5, %v2842_v5  ;;  %v2101_v8 = vld [vmem:[%s3114_s7] ss:$0 sm:$0xff]  ;;  %1048 = vmatpush.bf16.msra.mxu2 %v1959_v24 }
  0x88   : > { %s3116_s8 = scalar_lea.vmem %s3115_s27, %s2786_s12 }
  0x89   : > { %1888 = vmatmul.msk.bf16.vlgmr.msra.gmra.mxu0 %vm969_vm1, %v948_v6  ;;  %1897 = vmatmul.msk.bf16.vlgmr.msra.gmra.mxu1 %vm969_vm1, %v948_v6  ;;  %v2102_v45 = vld [vmem:[%s3116_s8] ss:$0 sm:$0xff]  ;;  %s3118_s13 = scalar_lea.vmem %s3117_s15, %s2786_s12  ;;  %s1562_s8 = sshll.u32 %s2836_s6, 4  ;;  %s1563_s8 = int_to_ptr.vmem [resolvable:$true] %s1562_s8 }
  0x8a   : > { %1906 = vmatmul.msk.bf16.vlgmr.msra.gmra.mxu2 %vm969_vm1, %v948_v6 }
 0x106   : > { %v982_v9 = vpop.f32.mrf.mxu0  ;;  %v1016_v10 = vpop.f32.mrf.mxu1 }
 0x107   : > { %v983_v11 = vadd.f32 %v2100_v7, %v982_v9  ;;  %v1017_v12 = vadd.f32 %v2101_v8, %v1016_v10 }
 0x109   : > { %v1020_v13 = vpack.c.bf16 %v1017_v12, %v1017_v12  ;;  %v986_v14 = vpack.c.bf16 %v983_v11, %v983_v11 }
 0x10b   : > { %v1118_v15 = vunpack.c.l.b16 %v1020_v13  ;;  %v1064_v16 = vsel %vm1059_vm2, %v1020_v13, 0  ;;  %v1113_v20 = vunpack.c.l.b16 %v986_v14 }
 0x10c   : > { %1073 = vmatpush.bf16.xpose.msra.mxu3 %v1064_v16 }
 0x10d   : > { %v1119_v17 = vpack.c.b16 %v1118_v15, %v1118_v15  ;;  %v1114_v21 = vpack.c.b16 %v1113_v20, %v1113_v20  ;;  %v1050_v44 = vpop.f32.mrf.mxu2 }
 0x10e   : > { %v984_v18 = vpop.f32.mrf.mxu0  ;;  %v1018_v19 = vpop.f32.mrf.mxu1  ;;  %v1051_v47 = vadd.f32 %v2102_v45, %v1050_v44 }
 0x10f   : > { %1218 = vrot.lane.b32.xlu2 %v1119_v17, %s2452_s23  ;;  %1120 = vrot.lane.b32.xlu1 %v1119_v17, %s2453_s17 }
 0x110   : > { %v1054_v48 = vpack.c.bf16 %v1051_v47, %v1051_v47 }
 0x112   : > { %v1096_v49 = vsel %vm1094_vm3, %v1054_v48, 0  ;;  %v1154_v3 = vunpack.c.l.b16 %v1054_v48 }
 0x113   : > { %1907 = vmatmul.msk.bf16.vlgmr.msra.gmra.mxu3 %vm1059_vm2, %v986_v14  ;;  %1105 = vmatpush.bf16.msrb.mxu0 %v1096_v49 }
 0x114   : > { %v1155_v6 = vpack.c.b16 %v1154_v3, %v1154_v3  ;;  %v2455_v3 = vmov 32.0  }
 0x115   : > { %v1052_v46 = vpop.f32.mrf.mxu2 }
 0x117   : > { %1216 = vrot.lane.b32.xlu2 %v1114_v21, %s2452_s23  ;;  %1115 = vrot.lane.b32.xlu1 %v1114_v21, %s2453_s17 }
 0x118   : > { %1210 = vmatpush.bf16.msra.mxu0 %v1201_v53 }
 0x11f   : > { %1293 = vrot.lane.b32.xlu1 %v1114_v21, %s2454_s1 }
 0x169   : > { %v1219_v23 = vpop.permute.xlu2 %1218 }
 0x16a   : > { %v1224_v27 = vsel %vm1059_vm2, %v1219_v23, 0  ;;  %v1056_v23 = vld [vmem:[%s2769_s21 + $0x4] sm:$0xf] }
 0x16b   : > { %v1182_v24 = vsel %vm1094_vm3, %v1056_v23, 0 }
 0x16c   : > { %1191 = vmatpush.bf16.msrb.mxu3 %v1182_v24 }
 0x171   : > { %v1217_v31 = vpop.permute.xlu2 %1216 }
 0x181   : > { %v1121_v25 = vpop.permute.xlu1 %1120 }
 0x182   : > { %v1126_v26 = vsel %vm1059_vm2, %v1121_v25, 0  ;;  %v1057_v25 = vld [vmem:[%s2769_s21 + $0x8] sm:$0xf] }
 0x183   : > { %1135 = vmatpush.bf16.xpose.msrb.mxu1 %v1126_v26  ;;  %v1277_v26 = vsel %vm1094_vm3, %v1057_v25, 0 }
 0x184   : > { %1286 = vmatpush.bf16.msra.mxu3 %v1277_v26 }
 0x189   : > { %v1116_v28 = vpop.permute.xlu1 %1115 }
 0x18a   : > { %1909 = vmatmul.msk.bf16.vlgmr.msrb.gmra.mxu1 %vm1059_vm2, %v1116_v28 }
 0x18b   : > { %1233 = vmatpush.bf16.xpose.msra.mxu1 %v1224_v27 }
 0x191   : > { %v1294_v55 = vpop.permute.xlu1 %1293 }
 0x196   : > { %v1075_v29 = vpop.f32.mrf.mxu3 }
 0x197   : > { %v1079_v30 = vsel %vm1059_vm2, %v1075_v29, -inf }
 0x198   : > { %1080 = vmax.xlane.f32.xlu0 %v1079_v30 }
 0x19a   : > { %1913 = vmatmul.msk.bf16.vlgmr.msra.gmra.mxu1 %vm1059_vm2, %v1217_v31 }
 0x19e   : > { %v1077_v32 = vpop.f32.mrf.mxu3 }
 0x207   : > { %v1137_v33 = vpop.f32.mrf.mxu1 }
 0x208   : > { %v1141_v34 = vsel %vm1059_vm2, %v1137_v33, -inf }
 0x209   : > { %1142 = vmax.xlane.f32.xlu2 %v1141_v34 }
 0x20b   : > { %v1081_v35 = vpop.xlane.xlu0 %1080 }
 0x20c   : > { %v1082_v36 = vsub.f32 %v1075_v29, %v1081_v35 }
 0x20e   : > { %v1083_v37 = vmul.f32 1.442695, %v1082_v36 }
 0x20f   : > { %v1139_v38 = vpop.f32.mrf.mxu1 }
 0x210   : > { %2110 = vpow2.f32 %v1083_v37 }
 0x216   : > { %v2111_v39 = vpop.eup %2110 }
 0x217   : > { %v1235_v40 = vpop.f32.mrf.mxu1  ;;  %v1085_v41 = vsel %vm1059_vm2, %v2111_v39, 0.0 }
 0x218   : > { %1086 = vadd.xlane.f32.xlu0 %v1085_v41  ;;  %v1239_v42 = vsel %vm1059_vm2, %v1235_v40, -inf }
 0x219   : > { %1240 = vmax.xlane.f32.xlu1 %v1239_v42 }
 0x21f   : > { %v1237_v43 = vpop.f32.mrf.mxu1 }
 0x22c   : > { %1295 = vrot.lane.b32.xlu0 %v1119_v17, %s2454_s1 }
 0x27c   : > { %v1143_v50 = vpop.xlane.xlu2 %1142 }
 0x27d   : > { %v1144_v51 = vsub.f32 %v1137_v33, %v1143_v50 }
 0x27f   : > { %v1145_v54 = vmul.f32 1.442695, %v1144_v51 }
 0x281   : > { %2112 = vpow2.f32 %v1145_v54 }
 0x287   : > { %v2113_v56 = vpop.eup %2112 }
 0x288   : > { %v1147_v57 = vsel %vm1059_vm2, %v2113_v56, 0.0 }
 0x289   : > { %1148 = vadd.xlane.f32.xlu2 %v1147_v57 }
 0x28b   : > { %v1087_v58 = vpop.xlane.xlu0 %1086 }
 0x28c   : > { %2114 = vrcp.f32 %v1087_v58  ;;  %v1241_v59 = vpop.xlane.xlu1 %1240 }
 0x28d   : > { %v1242_v60 = vsub.f32 %v1235_v40, %v1241_v59 }
 0x28f   : > { %v1243_v61 = vmul.f32 1.442695, %v1242_v60  ;;  %v2103_v60 = vld [vmem:[%s3118_s13] ss:$0 sm:$0xff] }
 0x291   : > { %2116 = vpow2.f32 %v1243_v61 }
 0x292   : > { %v2115_v62 = vpop.eup %2114 }
 0x293   : > { %v1089_v63 = vmul.f32 %v2115_v62, %v2111_v39 }
 0x295   : > { %v1090_v0 = vpack.c.bf16 %v1089_v63, %v1089_v63 }
 0x297   : > { %v2117_v1 = vpop.eup %2116  ;;  %1908 = vmatmul.msk.bf16.vlgmr.msrb.gmra.mxu0 %vm1059_vm2, %v1090_v0 }
 0x298   : > { %v1245_v2 = vsel %vm1059_vm2, %v2117_v1, 0.0 }
 0x299   : > { %1246 = vadd.xlane.f32.xlu1 %v1245_v2 }
 0x29e   : > { %v1296_v4 = vpop.permute.xlu0 %1295 }
 0x29f   : > { %v1301_v7 = vsel %vm1059_vm2, %v1296_v4, 0 }
 0x2a0   : > { %1310 = vmatpush.bf16.xpose.msrb.mxu0 %v1301_v7 }
 0x2a1   : > { %1156 = vrot.lane.b32.xlu2 %v1155_v6, %s2453_s17 }
 0x2b2   : > { %1251 = vrot.lane.b32.xlu1 %v1155_v6, %s2452_s23  ;;  %s3125_s23 = sld [smem:[#allocation53_spill]] }
 0x2b8   : > { %s2334_s12 = scalar_lea.hbm %s3125_s23, 16 }
 0x2fc   : > { %v1149_v8 = vpop.xlane.xlu2 %1148 }
 0x2fd   : > { %2118 = vrcp.f32 %v1149_v8 }
 0x303   : > { %v2119_v9 = vpop.eup %2118 }
 0x304   : > { %v1151_v10 = vmul.f32 %v2119_v9, %v2113_v56  ;;  %v1157_v11 = vpop.permute.xlu2 %1156 }
 0x305   : > { %v1162_v12 = vsel %vm1094_vm3, %v1157_v11, 0 }
 0x306   : > { %1171 = vmatpush.bf16.msrb.mxu2 %v1162_v12  ;;  %v1152_v13 = vpack.c.bf16 %v1151_v10, %v1151_v10 }
 0x309   : > { %1910 = vmatmul.msk.bf16.vlgmr.msrb.gmra.mxu2 %vm1059_vm2, %v1152_v13 }
 0x30c   : > { %v1247_v16 = vpop.xlane.xlu1 %1246 }
 0x30d   : > { %2120 = vrcp.f32 %v1247_v16  ;;  %v1961_v16 = vld [vmem:[%s2776_s16] sm:$0xff] }
 0x313   : > { %v2121_v18 = vpop.eup %2120 }
 0x314   : > { %v1107_v14 = vpop.f32.mrf.mxu0  ;;  %v1249_v19 = vmul.f32 %v2121_v18, %v2117_v1 }
 0x315   : > { %v1111_v15 = vpack.c.bf16 %v1107_v14, %v1107_v14 }
 0x316   : > { %v1250_v22 = vpack.c.bf16 %v1249_v19, %v1249_v19 }
 0x317   : > { %1912 = vmatmul.msk.bf16.vlgmr.msra.gmra.mxu0 %vm1059_vm2, %v1111_v15  ;;  %v1962_v15 = vld [vmem:[%s2776_s16 + $0x8] sm:$0xff] }
 0x31c   : > { %v1109_v17 = vpop.f32.mrf.mxu0 }
 0x324   : > { %v1252_v20 = vpop.permute.xlu1 %1251 }
 0x325   : > { %v1257_v21 = vsel %vm1094_vm3, %v1252_v20, 0 }
 0x326   : > { %1266 = vmatpush.bf16.msra.mxu2 %v1257_v21 }
 0x327   : > { %1916 = vmatmul.msk.bf16.vlgmr.msrb.gmra.mxu0 %vm1059_vm2, %v1294_v55  ;;  %v1058_v55 = vld [vmem:[%s2769_s21 + $0xc] sm:$0xf]  ;;  %s3119_s21 = scalar_lea.vmem [#allocation8], %s2761_s20  ;;  %s1550_s20 = scalar_lea.sflag [#allocation4], %s2747_s29 }
 0x328   : > { %v1354_v56 = vsel %vm1094_vm3, %v1058_v55, 0  ;;  %v2104_v26 = vld [vmem:[%s3119_s21] ss:$0 sm:$0xff] }
 0x329   : > { %1914 = vmatmul.msk.bf16.vlgmr.msra.gmra.mxu2 %vm1059_vm2, %v1250_v22 }
 0x32a   : > { %1363 = vmatpush.bf16.msrb.mxu2 %v1354_v56 }
 0x38c   : > { %v1173_v27 = vpop.f32.mrf.mxu2 }
 0x38d   : > { %v1177_v28 = vpack.c.bf16 %v1173_v27, %v1173_v27 }
 0x38f   : > { %1911 = vmatmul.msk.bf16.vlgmr.msrb.gmra.mxu3 %vm1059_vm2, %v1177_v28  ;;  %v2105_v28 = vld [vmem:[%s924_s30] ss:$0 sm:$0xff] }
 0x390   : > { %1445 = vmatpush.bf16.msrb.mxu3 %v1962_v15 }
 0x394   : > { %v1175_v29 = vpop.f32.mrf.mxu2  ;;  %v1212_v30 = vpop.f32.mrf.mxu0  ;;  %1446 = vmatpush.bf16.msrb.mxu3 %v1961_v16 }
 0x39c   : > { %v1214_v31 = vpop.f32.mrf.mxu0 }
 0x3a4   : > { %v1312_v32 = vpop.f32.mrf.mxu0 }
 0x3a5   : > { %v1316_v33 = vsel %vm1059_vm2, %v1312_v32, -inf }
 0x3a6   : > { %1317 = vmax.xlane.f32.xlu0 %v1316_v33  ;;  %v1966_v33 = vld [vmem:[%s2824_s3 + $0x18] sm:$0xff] }
 0x3a7   : > { %1506 = vmatpush.bf16.msra.mxu0 %v1966_v33 }
 0x3ac   : > { %v1268_v34 = vpop.f32.mrf.mxu2  ;;  %v1314_v35 = vpop.f32.mrf.mxu0 }
 0x3ad   : > { %v1272_v36 = vpack.c.bf16 %v1268_v34, %v1268_v34  ;;  %v1965_v34 = vld [vmem:[%s2824_s3 + $0x10] sm:$0xff]  ;;  %v1964_v35 = vld [vmem:[%s2824_s3 + $0x8] sm:$0xff] }
 0x3ae   : > { %1507 = vmatpush.bf16.msra.mxu0 %v1965_v34 }
 0x3af   : > { %1915 = vmatmul.msk.bf16.vlgmr.msra.gmra.mxu3 %vm1059_vm2, %v1272_v36  ;;  %v1963_v36 = vld [vmem:[%s2824_s3] sm:$0xff] }
 0x3b2   : > { %1508 = vmatpush.bf16.msra.mxu0 %v1964_v35 }
 0x3b4   : > { %v1270_v37 = vpop.f32.mrf.mxu2 }
 0x3b5   : > { %v2106_v37 = vld [vmem:[%s927_s0] ss:$0 sm:$0xff] }
 0x3b6   : > { %1509 = vmatpush.bf16.msra.mxu0 %v1963_v36 }
 0x412   : > { %v1193_v38 = vpop.f32.mrf.mxu3 }
 0x413   : > { %v1213_v45 = vadd.f32 %v1212_v30, %v1193_v38 }
 0x419   : > { %v1318_v39 = vpop.xlane.xlu0 %1317 }
 0x41a   : > { %v1319_v40 = vsub.f32 %v1312_v32, %v1318_v39  ;;  %v1195_v41 = vpop.f32.mrf.mxu3 }
 0x41c   : > { %v1320_v42 = vmul.f32 1.442695, %v1319_v40 }
 0x41e   : > { %2122 = vpow2.f32 %v1320_v42 }
 0x424   : > { %v2123_v43 = vpop.eup %2122 }
 0x425   : > { %v1322_v44 = vsel %vm1059_vm2, %v2123_v43, 0.0 }
 0x426   : > { %1323 = vadd.xlane.f32.xlu0 %v1322_v44 }
 0x432   : > { %v1288_v46 = vpop.f32.mrf.mxu3 }
 0x433   : > { %v1292_v47 = vadd.f32 %v1288_v46, %v1213_v45 }
 0x43a   : > { %1328 = vrot.lane.b32.xlu0 %v1155_v6, %s2454_s1  ;;  %v1290_v48 = vpop.f32.mrf.mxu3 }
 0x499   : > { %v1324_v49 = vpop.xlane.xlu0 %1323 }
 0x49a   : > { %2124 = vrcp.f32 %v1324_v49 }
 0x49b   : > { %2126 = vrcp.f32 %v2455_v3 }
 0x4a0   : > { %v2125_v50 = vpop.eup %2124 }
 0x4a1   : > { %v1326_v51 = vmul.f32 %v2125_v50, %v2123_v43  ;;  %v2127_v4 = vpop.eup %2126 }
 0x4a2   : > { %v1382_v6 = vmul.f32 32.0, %v2127_v4  ;;  %vm1386_vm4 = vweird.f32 %v2127_v4 }
 0x4a3   : > { %v1327_v54 = vpack.c.bf16 %v1326_v51, %v1326_v51  ;;  %v2107_v51 = vld [vmem:[%s935_s18] ss:$0 sm:$0xff]  ;;  %s1946_s18 = sshll.u32 %s3123_s9, 3 }
 0x4a4   : > { %v1383_v7 = vsub.f32 1.0, %v1382_v6  ;;  %s1560_s17 = scalar_lea.hbm %s3125_s23, %s1946_s18 }
 0x4a5   : > { %s1564_s24 = sshll.u32 %s1560_s17, 4  ;;  %s1565_s24 = int_to_ptr.hbm [resolvable:$true] %s1564_s24 }
 0x4a6   : > { %v1384_v8 = vmul.f32 %v2127_v4, %v1383_v7  ;;  %s2328_s11 = sshra.s32 %s1565_s24, 4  ;;  %s2329_s11 = int_to_ptr.hbm [resolvable:$true] %s2328_s11 }
 0x4a7   : > { %s2330_s15 = scalar_lea.hbm %s2329_s11, 8  ;;  %p2335_p4 = scmp.lt.s32.totalorder %s2329_s11, %s3125_s23 }
 0x4a8   : > { %v1385_v9 = vadd.f32 %v2127_v4, %v1384_v8  ;;  %v2108_v8 = vld [vmem:[%s3124_s26] ss:$0 sm:$0xff]  ;;  %p2331_p8 = scmp.ne.s32.totalorder %s2329_s11, %s2330_s15  ;;  %p2336_p6 = scmp.lt.s32.totalorder %s2334_s12, %s2330_s15 }
 0x4aa   : > { %v2915_v10 = vsel %vm1386_vm4, %v2127_v4, %v1385_v9  ;;  %p2332_p11 = pnand %p2331_p8, %p2703_p1  ;;  %p2337_p0 = por %p2336_p6, %p2335_p4 }
 0x4ac   : > { %v1329_v52 = vpop.permute.xlu0 %1328  ;;  %p2333_p12 = pneg %p2332_p11 }
 0x4ad   : > { %v1334_v53 = vsel %vm1094_vm3, %v1329_v52, 0 }
 0x4ae   : > { %1343 = vmatpush.bf16.msrb.mxu1 %v1334_v53  ;;  %p2338_p7 = pnand %p2337_p0, %p2333_p12 }
 0x4b1   : > { %1917 = vmatmul.msk.bf16.vlgmr.msrb.gmra.mxu1 %vm1059_vm2, %v1327_v54 }
 0x52e   : > { %v1345_v57 = vpop.f32.mrf.mxu1 }
 0x52f   : > { %v1349_v58 = vpack.c.bf16 %v1345_v57, %v1345_v57 }
 0x531   : > { %1918 = vmatmul.msk.bf16.vlgmr.msrb.gmra.mxu2 %vm1059_vm2, %v1349_v58 }
 0x536   : > { %v1347_v59 = vpop.f32.mrf.mxu1 }
 0x5b4   : > { %v1365_v61 = vpop.f32.mrf.mxu2 }
 0x5b5   : > { %v1369_v62 = vadd.f32 %v1365_v61, %v1292_v47 }
 0x5b7   : > { %v1374_v63 = vadd.f32 %v2103_v60, %v1369_v62 }
 0x5b9   : > { %v1375_v0 = vadd.f32 %v1374_v63, %v2842_v5 }
 0x5bb   : > { %v1378_v1 = vsel %vm969_vm1, %v1375_v0, 0.0 }
 0x5bc   : > { %v1367_v2 = vpop.f32.mrf.mxu2  ;;  %1379 = vadd.xlane.f32.xlu2 %v1378_v1 }
 0x62f   : > { %v1380_v11 = vpop.xlane.xlu2 %1379 }
 0x630   : > { %v1388_v12 = vmul.f32 %v2915_v10, %v1380_v11  ;;  %v2109_v11 = vld [vmem:[%s938_s10] ss:$0 sm:$0xff] }
 0x632   : > { %v1389_v5 = vsub.f32 %v1375_v0, %v1388_v12 }
 0x634   : > { %v1390_v13 = vmul.f32 %v1389_v5, %v1389_v5 }
 0x636   : > { %v1391_v14 = vsel %vm969_vm1, %v1390_v13, 0.0 }
 0x637   : > { %1392 = vadd.xlane.f32.xlu1 %v1391_v14 }
 0x6aa   : > { %v1393_v17 = vpop.xlane.xlu1 %1392 }
 0x6ab   : > { %v1394_v18 = vmul.f32 %v1393_v17, %v2915_v10 }
 0x6ad   : > { %v1395_v19 = vadd.f32 1e-05, %v1394_v18 }
 0x6af   : > { %2128 = vrsqrt.f32 %v1395_v19  ;;  %vm1402_vm6 = vweird.f32 %v1395_v19 }
 0x6b5   : > { %v2129_v20 = vpop.eup %2128 }
 0x6b6   : > { %v1397_v21 = vmul.f32 %v2129_v20, %v1395_v19  ;;  %vm1403_vm5 = vweird.f32 %v2129_v20 }
 0x6b7   : > { %vm1404_vm7 = vmor %vm1402_vm6, %vm1403_vm5 }
 0x6b8   : > { %v1398_v22 = vmul.f32 %v2129_v20, %v1397_v21 }
 0x6ba   : > { %v1399_v23 = vmul.f32 0.5, %v1398_v22 }
 0x6bc   : > { %v1400_v24 = vsub.f32 1.5, %v1399_v23 }
 0x6be   : > { %v1401_v25 = vmul.f32 %v2129_v20, %v1400_v24 }
 0x6c0   : > { %v1405_v27 = vsel %vm1404_vm7, %v2129_v20, %v1401_v25 }
 0x6c1   : > { %v1406_v29 = vmul.f32 %v1405_v27, %v1389_v5 }
 0x6c3   : > { %v1410_v30 = vmul.f32 %v2104_v26, %v1406_v29 }
 0x6c5   : > { %v1414_v31 = vadd.f32 %v2105_v28, %v1410_v30 }
 0x6c7   : > { %v1415_v32 = vpack.c.bf16 %v1414_v31, %v1414_v31 }
 0x6c9   : > { %1927 = vmatmul.msk.bf16.vlgmr.msrb.gmra.mxu3 %vm969_vm1, %v1415_v32 }
 0x74c   : > { %v1448_v38 = vpop.f32.mrf.mxu3 }
 0x74d   : > { %v1449_v39 = vadd.f32 %v2106_v37, %v1448_v38 }
 0x74f   : > { %v1452_v40 = vmul.f32 %v1449_v39, %v1449_v39 }
 0x751   : > { %v1453_v41 = vmul.f32 %v1452_v40, %v1449_v39 }
 0x753   : > { %v1454_v42 = vmul.f32 0.044715, %v1453_v41 }
 0x754   : > { %v1450_v43 = vpop.f32.mrf.mxu3 }
 0x755   : > { %v1455_v44 = vadd.f32 %v1454_v42, %v1449_v39 }
 0x757   : > { %v1456_v45 = vmul.f32 0.7978846, %v1455_v44 }
 0x759   : > { %2130 = vtanh.f32 %v1456_v45 }
 0x75f   : > { %v2131_v46 = vpop.eup %2130 }
 0x760   : > { %v1458_v47 = vadd.f32 1.0, %v2131_v46 }
 0x762   : > { %v1459_v48 = vmul.f32 0.5, %v1458_v47 }
 0x764   : > { %v1460_v49 = vmul.f32 %v1459_v48, %v1449_v39 }
 0x766   : > { %v1461_v50 = vpack.c.bf16 %v1460_v49, %v1460_v49 }
 0x768   : > { %1944 = vmatmul.msk.bf16.vlgmr.msra.gmra.mxu0 %vm1498_vm8, %v1461_v50 }
 0x7e5   : > { %v1511_v52 = vpop.f32.mrf.mxu0 }
 0x7e6   : > { %v1512_v53 = vadd.f32 %v2107_v51, %v1511_v52 }
 0x7e8   : > { %v1515_v54 = vadd.f32 %v1512_v53, %v1414_v31 }
 0x7ea   : > { %v1518_v55 = vsel %vm969_vm1, %v1515_v54, 0.0 }
 0x7eb   : > { %1519 = vadd.xlane.f32.xlu0 %v1518_v55 }
 0x7ed   : > { %v1513_v56 = vpop.f32.mrf.mxu0 }
 0x85e   : > { %v1520_v57 = vpop.xlane.xlu0 %1519 }
 0x85f   : > { %v1521_v58 = vmul.f32 %v1520_v57, %v2915_v10 }
 0x861   : > { %v1522_v59 = vsub.f32 %v1515_v54, %v1521_v58 }
 0x863   : > { %v1523_v60 = vmul.f32 %v1522_v59, %v1522_v59 }
 0x865   : > { %v1524_v61 = vsel %vm969_vm1, %v1523_v60, 0.0 }
 0x866   : > { %1525 = vadd.xlane.f32.xlu2 %v1524_v61 }
 0x8d9   : > { %v1526_v62 = vpop.xlane.xlu2 %1525 }
 0x8da   : > { %v1527_v63 = vmul.f32 %v1526_v62, %v2915_v10 }
 0x8dc   : > { %v1528_v0 = vadd.f32 1e-05, %v1527_v63 }
 0x8de   : > { %2132 = vrsqrt.f32 %v1528_v0  ;;  %vm1535_vm10 = vweird.f32 %v1528_v0 }
 0x8e4   : > { %v2133_v1 = vpop.eup %2132 }
 0x8e5   : > { %v1530_v2 = vmul.f32 %v2133_v1, %v1528_v0  ;;  %vm1536_vm9 = vweird.f32 %v2133_v1 }
 0x8e6   : > { %vm1537_vm11 = vmor %vm1535_vm10, %vm1536_vm9 }
 0x8e7   : > { %v1531_v3 = vmul.f32 %v2133_v1, %v1530_v2 }
 0x8e9   : > { %v1532_v4 = vmul.f32 0.5, %v1531_v3 }
 0x8eb   : > { %v1533_v6 = vsub.f32 1.5, %v1532_v4 }
 0x8ed   : > { %v1534_v7 = vmul.f32 %v2133_v1, %v1533_v6 }
 0x8ef   : > { %v1538_v9 = vsel %vm1537_vm11, %v2133_v1, %v1534_v7 }
 0x8f0   : > { %v1539_v10 = vmul.f32 %v1538_v9, %v1522_v59 }
 0x8f2   : > { %v1543_v12 = vmul.f32 %v2108_v8, %v1539_v10 }
 0x8f4   : > { %v1547_v5 = vadd.f32 %v2109_v11, %v1543_v12 }
 0x8f6   : > { %1548 = vst.msk [vmem:[%s2836_s6] sm:$0xff] %vm969_vm1, %v1547_v5 }
 0x8f7   : > { %2341 = shalt.err (!%p2338_p7)
}
 0x8f8   : > { %1979 = dma.vmem_to_hbm [thread:$0]  (%p2703_p1), %s1563_s8, 128, %s1565_s24, %s1550_s20  }
 0x8f9 PF: > { %s3128_s29 = sld [smem:[#allocation28_spill]] }
 0x8fa   : > { %s3129_s6 = sld [smem:[#allocation21_spill]] }
 0x8ff   : > { %p2005_p9 = scmp.ge.s32.totalorder %s3128_s29, 2 }
 0x900   : > { %s1576_s5 = sand.u32 1, %s3129_s6  }
 0x901   : > { %p2001_p10 = pnand %p2005_p9, %p2710_p2  ;;  %s1577_s2 = scalar_lea.sflag [#allocation4], %s1576_s5 }
 0x903   : > { %p2002_p13 = pneg %p2001_p10 }
 0x905   : > { %2403 = dma.done.wait (%p2002_p13), %s1577_s2, 128  }
 0x906   : > { %2405 = vsyncadd (%p2002_p13), %s1577_s2, 4294967168  ;;  %s42_s1 = sadd.s32 1, %s3128_s29   ;;  %s3131_s24 = sld [smem:[#allocation19_spill]] }
 0x907   : > { %p39_p3 = scmp.ge.s32.totalorder %s42_s1, 6   ;;  %s3132_s25 = sld [smem:[#allocation20_spill]] }
 0x908   : > { %s3133_s26 = sld [smem:[#allocation31_spill]] }
 0x909   : > { %s3134_s27 = sld [smem:[#allocation22_spill]] }
 0x90a   : > { %s3135_s28 = sld [smem:[#allocation23_spill]] }
 0x90b   : > { %s3136_s29 = sld [smem:[#allocation33_spill]]  ;;  %41 = sbr.rel (!%p39_p3) target bundleno = 34 (0x22), region = 231 }
 0x90c   : > { %s3137_s0 = sld [smem:[#allocation26_spill]] }
 0x90d   : > { %s3138_s30 = sld [smem:[#allocation27_spill]] }
 0x90e   : > { %s3139_s18 = sld [smem:[#allocation29_spill]] }
 0x90f   : > { %s3140_s19 = sld [smem:[#allocation30_spill]] }
 0x910   :  { %1583 = vsyncpa [#allocation3], 1 }
 0x911   :  { %1585 = vsyncpa [#allocation3 + $0x1], 1 }
 0x912   :  { %1586 = vsyncpa [#allocation6], 1 }
 0x913   :  { %1588 = vsyncpa [#allocation6 + $0x1], 1 }
 0x914   :  { %1589 = vsyncpa [#allocation9], 1 }
 0x915   :  { %1591 = vsyncpa [#allocation9 + $0x1], 1 }
 0x916   :  { %1592 = vsyncpa [#allocation12], 1 }
 0x917   :  { %1594 = vsyncpa [#allocation12 + $0x1], 1 }
 0x918   :  { %1595 = vsyncpa [#allocation4], 1 }
 0x919   :  { %1597 = vsyncpa [#allocation4 + $0x1], 1 }

</bundles_post_ra>
